<compile_context>
chip_gen: v5e
topology: v5e:2x2
jax: 0.10.0
libtpu: 0.0.40
codegen_flags: <defaults>
</compile_context>

<pallas_src>
import functools

import jax
import jax.numpy as jnp
from jax import lax
from jax.experimental import pallas as pl
from jax.experimental.pallas import tpu as pltpu

_VMEM_LIMIT = 32 * 1024 * 1024   # safe on v5e (128 MiB phys), v6e (128), v7x (64)
_ROW_TILE_CAP = 256              # row tile cap, sized for v7x's smaller VMEM


def _cparams(n_axes=1):
    return pltpu.CompilerParams(
        dimension_semantics=("parallel",) * n_axes,
        vmem_limit_bytes=_VMEM_LIMIT)


def _row_tile(m, cap=_ROW_TILE_CAP):
    """Largest row tile <= cap that evenly divides m (multiple of 8 when tiling)."""
    if m <= cap:
        return m
    t = cap - cap % 8
    while t >= 8:
        if m % t == 0:
            return t
        t -= 8
    return m


# ----------------------------- Pallas kernels ------------------------------------ #

def multi_project(x, weights):
    """x: (M, K); weights: list of (K, Ni). Returns list of (M, Ni) = x @ Wi (no bias).

    One pallas_call: x is streamed in row tiles, all weights stay VMEM-resident, so x
    is read from HBM once for all projections (fused Q/K/V)."""
    M, K = x.shape
    n = len(weights)
    tm = _row_tile(M)

    def kernel(x_ref, *refs):
        xb = x_ref[...]
        for w_ref, o_ref in zip(refs[:n], refs[n:]):
            o_ref[...] = jnp.dot(xb, w_ref[...], preferred_element_type=jnp.float32)

    in_specs = [pl.BlockSpec((tm, K), lambda i: (i, 0))]
    in_specs += [pl.BlockSpec(w.shape, lambda i: (0, 0)) for w in weights]
    out_specs = [pl.BlockSpec((tm, w.shape[1]), lambda i: (i, 0)) for w in weights]
    out_shape = [jax.ShapeDtypeStruct((M, w.shape[1]), jnp.float32) for w in weights]

    return pl.pallas_call(
        kernel,
        out_shape=out_shape,
        grid=(M // tm,),
        in_specs=in_specs,
        out_specs=out_specs,
        compiler_params=_cparams(1),
    )(x, *weights)


def _attention_kernel(heads, d_model, q_ref, k_ref, v_ref, o_ref):
    qb = q_ref[...]          # (Sq, H*dm)
    kb = k_ref[...]          # (Sk, H*dm)
    vb = v_ref[...]          # (Sk, H*dm)
    outs = []
    for h in range(heads):   # static unroll; all heads share one DMA'd block
        lo = h * d_model
        q = lax.slice_in_dim(qb, lo, lo + d_model, axis=1)
        k = lax.slice_in_dim(kb, lo, lo + d_model, axis=1)
        v = lax.slice_in_dim(vb, lo, lo + d_model, axis=1)
        # NOTE: reference scaled_dot_product_attention does NOT scale by 1/sqrt(d).
        s = lax.dot_general(q, k, (((1,), (1,)), ((), ())),
                            preferred_element_type=jnp.float32)        # (Sq, Sk)
        s = s - jnp.max(s, axis=-1, keepdims=True)
        p = jnp.exp(s)
        p = p * pl.reciprocal(jnp.sum(p, axis=-1, keepdims=True), approx=True)
        outs.append(jnp.dot(p, v, preferred_element_type=jnp.float32))
    # Single lane-dense store, already in (Sq, heads*d_model) layout for unifyheads.
    o_ref[...] = jnp.concatenate(outs, axis=-1)


def attention(q, k, v, batch, sq, sk, heads, d_model):
    """q: (B*Sq, H*dm), k/v: (B*Sk, H*dm) -> (B*Sq, H*dm).

    Grid over batch; heads handled in-kernel, so no head-split transposes in HBM and
    the output lands directly in the layout the output projection consumes."""
    hd = heads * d_model
    return pl.pallas_call(
        functools.partial(_attention_kernel, heads, d_model),
        out_shape=jax.ShapeDtypeStruct((batch * sq, hd), jnp.float32),
        grid=(batch,),
        in_specs=[pl.BlockSpec((sq, hd), lambda b: (b, 0)),
                  pl.BlockSpec((sk, hd), lambda b: (b, 0)),
                  pl.BlockSpec((sk, hd), lambda b: (b, 0))],
        out_specs=pl.BlockSpec((sq, hd), lambda b: (b, 0)),
        compiler_params=_cparams(1),
    )(q, k, v)


def _proj_add_ln_kernel(a_ref, w_ref, b_ref, r_ref, g_ref, bt_ref, o_ref):
    y = jnp.dot(a_ref[...], w_ref[...], preferred_element_type=jnp.float32)
    y = y + b_ref[...] + r_ref[...]
    mean = jnp.mean(y, axis=-1, keepdims=True)
    c = y - mean
    var = jnp.mean(c * c, axis=-1, keepdims=True)
    o_ref[...] = c * lax.rsqrt(var + 1e-5) * g_ref[...] + bt_ref[...]


def proj_add_ln(a, w, b, res, gamma, beta):
    """LayerNorm(res + a @ w + b): unify-heads projection fused with residual + LN."""
    M, K = a.shape
    D = w.shape[1]
    tm = _row_tile(M)
    return pl.pallas_call(
        _proj_add_ln_kernel,
        out_shape=jax.ShapeDtypeStruct((M, D), jnp.float32),
        grid=(M // tm,),
        in_specs=[pl.BlockSpec((tm, K), lambda i: (i, 0)),
                  pl.BlockSpec((K, D), lambda i: (0, 0)),
                  pl.BlockSpec((1, D), lambda i: (0, 0)),
                  pl.BlockSpec((tm, D), lambda i: (i, 0)),
                  pl.BlockSpec((1, D), lambda i: (0, 0)),
                  pl.BlockSpec((1, D), lambda i: (0, 0))],
        out_specs=pl.BlockSpec((tm, D), lambda i: (i, 0)),
        compiler_params=_cparams(1),
    )(a, w, b.reshape(1, D), res, gamma.reshape(1, D), beta.reshape(1, D))


def _ffn_add_ln_kernel(x_ref, w1_ref, b1_ref, w2_ref, b2_ref, g_ref, bt_ref, o_ref):
    xb = x_ref[...]
    h = jnp.dot(xb, w1_ref[...], preferred_element_type=jnp.float32) + b1_ref[...]
    h = jnp.maximum(h, 0.0)
    y = jnp.dot(h, w2_ref[...], preferred_element_type=jnp.float32) + b2_ref[...] + xb
    mean = jnp.mean(y, axis=-1, keepdims=True)
    c = y - mean
    var = jnp.mean(c * c, axis=-1, keepdims=True)
    o_ref[...] = c * lax.rsqrt(var + 1e-5) * g_ref[...] + bt_ref[...]


def ffn_add_ln(x, w1, b1, w2, b2, gamma, beta):
    """LayerNorm(x + FFN(x)): Linear -> ReLU -> Linear fused with residual + LN."""
    M, D = x.shape
    F_ = w1.shape[1]
    tm = _row_tile(M)
    return pl.pallas_call(
        _ffn_add_ln_kernel,
        out_shape=jax.ShapeDtypeStruct((M, D), jnp.float32),
        grid=(M // tm,),
        in_specs=[pl.BlockSpec((tm, D), lambda i: (i, 0)),
                  pl.BlockSpec((D, F_), lambda i: (0, 0)),
                  pl.BlockSpec((1, F_), lambda i: (0, 0)),
                  pl.BlockSpec((F_, D), lambda i: (0, 0)),
                  pl.BlockSpec((1, D), lambda i: (0, 0)),
                  pl.BlockSpec((1, D), lambda i: (0, 0)),
                  pl.BlockSpec((1, D), lambda i: (0, 0))],
        out_specs=pl.BlockSpec((tm, D), lambda i: (i, 0)),
        compiler_params=_cparams(1),
    )(x, w1, b1.reshape(1, F_), w2, b2.reshape(1, D),
      gamma.reshape(1, D), beta.reshape(1, D))


# ----------------------------- Module glue (plain JAX) ---------------------------- #

def mha_block(xq, xkv, batch, sq, sk, p, heads, d_model, residual, gamma, beta):
    """MultiHeadAttention + residual add + LayerNorm. xq: (B*Sq, D), xkv: (B*Sk, D)."""
    if xq is xkv:
        # Self-attention: one fused QKV projection (single read of xq).
        q, k, v = multi_project(xq, [p["wq"], p["wk"], p["wv"]])
    else:
        # Cross-attention: q from decoder stream, fused K/V projection of encoder out.
        (q,) = multi_project(xq, [p["wq"]])
        k, v = multi_project(xkv, [p["wk"], p["wv"]])
    o = attention(q, k, v, batch, sq, sk, heads, d_model)        # (B*Sq, H*dm)
    return proj_add_ln(o, p["wu"], p["bu"], residual, gamma, beta)


def decoder_layer(x, enc_out, params, heads, d_model, mask=None):
    """x: (B, S_dec, D), enc_out: (B, S_enc, D) -> (B, S_dec, D)."""
    assert mask is None  # TODO(synk): attention mask not implemented
    B, S, D = x.shape
    S_enc = enc_out.shape[1]
    x2 = x.reshape(B * S, D)
    enc2 = enc_out.reshape(B * S_enc, D)

    x2 = mha_block(x2, x2, B, S, S, params["attn1"], heads, d_model,
                   residual=x2, gamma=params["ln1_g"], beta=params["ln1_b"])
    x2 = mha_block(x2, enc2, B, S, S_enc, params["attn2"], heads, d_model,
                   residual=x2, gamma=params["ln2_g"], beta=params["ln2_b"])
    x2 = ffn_add_ln(x2, params["ff_w1"], params["ff_b1"], params["ff_w2"],
                    params["ff_b2"], params["ln3_g"], params["ln3_b"])
    return x2.reshape(B, S, D)


# ----------------------------- Parameter init ------------------------------------- #

def init_params(key, heads, d_model, dff):
    ks = jax.random.split(key, 16)
    w = lambda k, shape, s=0.05: s * jax.random.normal(k, shape, dtype=jnp.float32)

    def attn_params(keys):
        return dict(
            wq=w(keys[0], (d_model, heads * d_model)),
            wk=w(keys[1], (d_model, heads * d_model)),
            wv=w(keys[2], (d_model, heads * d_model)),
            wu=w(keys[3], (heads * d_model, d_model)),
            bu=w(keys[4], (d_model,)),
        )

    return dict(
        attn1=attn_params(ks[0:5]),
        attn2=attn_params(ks[5:10]),
        ff_w1=w(ks[10], (d_model, dff)),
        ff_b1=w(ks[11], (dff,)),
        ff_w2=w(ks[12], (dff, d_model)),
        ff_b2=w(ks[13], (d_model,)),
        ln1_g=jnp.ones((d_model,), jnp.float32), ln1_b=jnp.zeros((d_model,), jnp.float32),
        ln2_g=jnp.ones((d_model,), jnp.float32), ln2_b=jnp.zeros((d_model,), jnp.float32),
        ln3_g=jnp.ones((d_model,), jnp.float32), ln3_b=jnp.zeros((d_model,), jnp.float32),
    )


# ----------------------------- Pure-JAX reference --------------------------------- #

def _ref_linear(x, w, b):
    return jnp.dot(x, w, precision="highest") + b


def _ref_mha(q_in, k_in, v_in, p, heads, d_model):
    B, Sq, D = q_in.shape
    Sk = k_in.shape[1]
    q = _ref_linear(q_in.reshape(B * Sq, D), p["wq"], 0.0).reshape(B, Sq, heads, d_model)
    k = _ref_linear(k_in.reshape(B * Sk, D), p["wk"], 0.0).reshape(B, Sk, heads, d_model)
    v = _ref_linear(v_in.reshape(B * Sk, D), p["wv"], 0.0).reshape(B, Sk, heads, d_model)
    q = q.transpose(0, 2, 1, 3).reshape(B * heads, Sq, d_model)
    k = k.transpose(0, 2, 1, 3).reshape(B * heads, Sk, d_model)
    v = v.transpose(0, 2, 1, 3).reshape(B * heads, Sk, d_model)
    s = jnp.einsum("bqd,bkd->bqk", q, k, precision="highest")
    s = jax.nn.softmax(s, axis=-1)
    o = jnp.einsum("bqk,bkd->bqd", s, v, precision="highest")
    o = o.reshape(B, heads, Sq, d_model).transpose(0, 2, 1, 3).reshape(B * Sq, heads * d_model)
    return _ref_linear(o, p["wu"], p["bu"]).reshape(B, Sq, D)


def _ref_add_ln(x, r, g, b):
    y = x + r
    m = jnp.mean(y, axis=-1, keepdims=True)
    v = jnp.mean((y - m) ** 2, axis=-1, keepdims=True)
    return (y - m) / jnp.sqrt(v + 1e-5) * g + b


def ref_decoder_layer(x, enc_out, params, heads, d_model):
    B, S, D = x.shape
    a1 = _ref_mha(x, x, x, params["attn1"], heads, d_model)
    x = _ref_add_ln(x, a1, params["ln1_g"], params["ln1_b"])
    a2 = _ref_mha(x, enc_out, enc_out, params["attn2"], heads, d_model)
    x = _ref_add_ln(x, a2, params["ln2_g"], params["ln2_b"])
    h = jnp.maximum(_ref_linear(x.reshape(B * S, D), params["ff_w1"], params["ff_b1"]), 0.0)
    f = _ref_linear(h, params["ff_w2"], params["ff_b2"]).reshape(B, S, D)
    x = _ref_add_ln(x, f, params["ln3_g"], params["ln3_b"])
    return x


# ----------------------------- Main ------------------------------------------------ #

if __name__ == "__main__":
    B, S_DEC, S_ENC = 2, 8, 16
    HEADS, D_MODEL, DFF = 2, 32, 64

    key = jax.random.PRNGKey(0)
    k_x, k_enc, k_p = jax.random.split(key, 3)

    x = jax.random.normal(k_x, (B, S_DEC, D_MODEL), dtype=jnp.float32)
    enc_out = jax.random.normal(k_enc, (B, S_ENC, D_MODEL), dtype=jnp.float32)
    params = init_params(k_p, HEADS, D_MODEL, DFF)

    fwd = jax.jit(functools.partial(decoder_layer, heads=HEADS, d_model=D_MODEL))
    out = fwd(x, enc_out, params)
    out = jax.block_until_ready(out)

    ref = ref_decoder_layer(x, enc_out, params, HEADS, D_MODEL)
    assert out.shape == (B, S_DEC, D_MODEL), out.shape
    assert jnp.allclose(out, ref, rtol=5e-3, atol=5e-3), float(jnp.max(jnp.abs(out - ref)))

    print("KERNEL_OK")
</pallas_src>

<mosaic_0001>
module attributes {stable_mosaic.version = 11 : i64} {
  func.func @_proj_add_ln_kernel(%arg0: i32, %arg1: memref<16x64xf32, #tpu.memory_space<vmem>>, %arg2: memref<64x32xf32, #tpu.memory_space<vmem>>, %arg3: memref<1x32xf32, #tpu.memory_space<vmem>>, %arg4: memref<16x32xf32, #tpu.memory_space<vmem>>, %arg5: memref<1x32xf32, #tpu.memory_space<vmem>>, %arg6: memref<1x32xf32, #tpu.memory_space<vmem>>, %arg7: memref<16x32xf32, #tpu.memory_space<vmem>>) attributes {dimension_semantics = [#tpu.dimension_semantics<parallel>], iteration_bounds = array<i64: 1>, scalar_prefetch = 0 : i64, scratch_operands = 0 : i64, tpu.core_type = #tpu.core_type<tc>, window_params = [{transform_indices = @transform_0, window_bounds = array<i64: 16, 64>}, {pipeline_mode = #tpu.pipeline_mode<synchronous>, transform_indices = @transform_1, window_bounds = array<i64: 64, 32>}, {pipeline_mode = #tpu.pipeline_mode<synchronous>, transform_indices = @transform_2, window_bounds = array<i64: 1, 32>}, {transform_indices = @transform_3, window_bounds = array<i64: 16, 32>}, {pipeline_mode = #tpu.pipeline_mode<synchronous>, transform_indices = @transform_4, window_bounds = array<i64: 1, 32>}, {pipeline_mode = #tpu.pipeline_mode<synchronous>, transform_indices = @transform_5, window_bounds = array<i64: 1, 32>}, {transform_indices = @transform_6, window_bounds = array<i64: 16, 32>}]} {
    %c0 = arith.constant 0 : index
    %c0_0 = arith.constant 0 : index
    %0 = vector.load %arg1[%c0, %c0_0] : memref<16x64xf32, #tpu.memory_space<vmem>>, vector<16x64xf32>
    %c0_1 = arith.constant 0 : index
    %c0_2 = arith.constant 0 : index
    %1 = vector.load %arg2[%c0_1, %c0_2] : memref<64x32xf32, #tpu.memory_space<vmem>>, vector<64x32xf32>
    %cst = arith.constant dense<0.000000e+00> : vector<16x32xf32>
    %2 = tpu.matmul %0, %1, %cst {dimension_numbers = #tpu.dot_dimension_numbers<[1], [0], [0], [1], [0, 0, 1, 1], [], []>} : vector<16x64xf32>, vector<64x32xf32>, vector<16x32xf32> -> vector<16x32xf32>
    %c0_3 = arith.constant 0 : index
    %c0_4 = arith.constant 0 : index
    %3 = vector.load %arg3[%c0_3, %c0_4] : memref<1x32xf32, #tpu.memory_space<vmem>>, vector<1x32xf32>
    %4 = vector.broadcast %3 : vector<1x32xf32> to vector<16x32xf32>
    %5 = arith.addf %2, %4 : vector<16x32xf32>
    %c0_5 = arith.constant 0 : index
    %c0_6 = arith.constant 0 : index
    %6 = vector.load %arg4[%c0_5, %c0_6] : memref<16x32xf32, #tpu.memory_space<vmem>>, vector<16x32xf32>
    %7 = arith.addf %5, %6 : vector<16x32xf32>
    %cst_7 = arith.constant dense<0.000000e+00> : vector<16xf32>
    %8 = vector.multi_reduction <add>, %7, %cst_7 [1] : vector<16x32xf32> to vector<16xf32>
    %9 = vector.shape_cast %8 : vector<16xf32> to vector<16x1xf32>
    %cst_8 = arith.constant 3.200000e+01 : f32
    %10 = vector.broadcast %cst_8 : f32 to vector<16x1xf32>
    %11 = arith.divf %9, %10 : vector<16x1xf32>
    %12 = vector.broadcast %11 : vector<16x1xf32> to vector<16x32xf32>
    %13 = arith.subf %7, %12 : vector<16x32xf32>
    %14 = arith.mulf %13, %13 : vector<16x32xf32>
    %cst_9 = arith.constant dense<0.000000e+00> : vector<16xf32>
    %15 = vector.multi_reduction <add>, %14, %cst_9 [1] : vector<16x32xf32> to vector<16xf32>
    %16 = vector.shape_cast %15 : vector<16xf32> to vector<16x1xf32>
    %cst_10 = arith.constant 3.200000e+01 : f32
    %17 = vector.broadcast %cst_10 : f32 to vector<16x1xf32>
    %18 = arith.divf %16, %17 : vector<16x1xf32>
    %cst_11 = arith.constant 9.99999974E-6 : f32
    %19 = vector.broadcast %cst_11 : f32 to vector<16x1xf32>
    %20 = arith.addf %18, %19 : vector<16x1xf32>
    %21 = math.rsqrt %20 : vector<16x1xf32>
    %22 = vector.broadcast %21 : vector<16x1xf32> to vector<16x32xf32>
    %23 = arith.mulf %13, %22 : vector<16x32xf32>
    %c0_12 = arith.constant 0 : index
    %c0_13 = arith.constant 0 : index
    %24 = vector.load %arg5[%c0_12, %c0_13] : memref<1x32xf32, #tpu.memory_space<vmem>>, vector<1x32xf32>
    %25 = vector.broadcast %24 : vector<1x32xf32> to vector<16x32xf32>
    %26 = arith.mulf %23, %25 : vector<16x32xf32>
    %c0_14 = arith.constant 0 : index
    %c0_15 = arith.constant 0 : index
    %27 = vector.load %arg6[%c0_14, %c0_15] : memref<1x32xf32, #tpu.memory_space<vmem>>, vector<1x32xf32>
    %28 = vector.broadcast %27 : vector<1x32xf32> to vector<16x32xf32>
    %29 = arith.addf %26, %28 : vector<16x32xf32>
    %c0_16 = arith.constant 0 : index
    %c0_17 = arith.constant 0 : index
    %30 = vector.load %arg7[%c0_16, %c0_17] : memref<16x32xf32, #tpu.memory_space<vmem>>, vector<16x32xf32>
    tpu.vector_store %arg7[%c0_16, %c0_17], %29 {strides = array<i32>} : memref<16x32xf32, #tpu.memory_space<vmem>>, vector<16x32xf32>,
    return
  }
  func.func @transform_0(%arg0: i32) -> (i32, i32) {
    %c0_i32 = arith.constant 0 : i32
    %c0_i32_0 = arith.constant 0 : i32
    return %arg0, %c0_i32 : i32, i32
  }
  func.func @transform_1(%arg0: i32) -> (i32, i32) {
    %c0_i32 = arith.constant 0 : i32
    %c0_i32_0 = arith.constant 0 : i32
    %c0_i32_1 = arith.constant 0 : i32
    return %c0_i32, %c0_i32_0 : i32, i32
  }
  func.func @transform_2(%arg0: i32) -> (i32, i32) {
    %c0_i32 = arith.constant 0 : i32
    %c0_i32_0 = arith.constant 0 : i32
    %c0_i32_1 = arith.constant 0 : i32
    return %c0_i32, %c0_i32_0 : i32, i32
  }
  func.func @transform_3(%arg0: i32) -> (i32, i32) {
    %c0_i32 = arith.constant 0 : i32
    %c0_i32_0 = arith.constant 0 : i32
    return %arg0, %c0_i32 : i32, i32
  }
  func.func @transform_4(%arg0: i32) -> (i32, i32) {
    %c0_i32 = arith.constant 0 : i32
    %c0_i32_0 = arith.constant 0 : i32
    %c0_i32_1 = arith.constant 0 : i32
    return %c0_i32, %c0_i32_0 : i32, i32
  }
  func.func @transform_5(%arg0: i32) -> (i32, i32) {
    %c0_i32 = arith.constant 0 : i32
    %c0_i32_0 = arith.constant 0 : i32
    %c0_i32_1 = arith.constant 0 : i32
    return %c0_i32, %c0_i32_0 : i32, i32
  }
  func.func @transform_6(%arg0: i32) -> (i32, i32) {
    %c0_i32 = arith.constant 0 : i32
    %c0_i32_0 = arith.constant 0 : i32
    return %arg0, %c0_i32 : i32, i32
  }
}

module attributes {stable_mosaic.version = 11 : i64} {
  func.func @kernel(%arg0: i32, %arg1: memref<16x32xf32, #tpu.memory_space<vmem>>, %arg2: memref<32x64xf32, #tpu.memory_space<vmem>>, %arg3: memref<32x64xf32, #tpu.memory_space<vmem>>, %arg4: memref<32x64xf32, #tpu.memory_space<vmem>>, %arg5: memref<16x64xf32, #tpu.memory_space<vmem>>, %arg6: memref<16x64xf32, #tpu.memory_space<vmem>>, %arg7: memref<16x64xf32, #tpu.memory_space<vmem>>) attributes {dimension_semantics = [#tpu.dimension_semantics<parallel>], iteration_bounds = array<i64: 1>, scalar_prefetch = 0 : i64, scratch_operands = 0 : i64, tpu.core_type = #tpu.core_type<tc>, window_params = [{transform_indices = @transform_0, window_bounds = array<i64: 16, 32>}, {pipeline_mode = #tpu.pipeline_mode<synchronous>, transform_indices = @transform_1, window_bounds = array<i64: 32, 64>}, {pipeline_mode = #tpu.pipeline_mode<synchronous>, transform_indices = @transform_2, window_bounds = array<i64: 32, 64>}, {pipeline_mode = #tpu.pipeline_mode<synchronous>, transform_indices = @transform_3, window_bounds = array<i64: 32, 64>}, {transform_indices = @transform_4, window_bounds = array<i64: 16, 64>}, {transform_indices = @transform_5, window_bounds = array<i64: 16, 64>}, {transform_indices = @transform_6, window_bounds = array<i64: 16, 64>}]} {
    %c0 = arith.constant 0 : index
    %c0_0 = arith.constant 0 : index
    %0 = vector.load %arg1[%c0, %c0_0] : memref<16x32xf32, #tpu.memory_space<vmem>>, vector<16x32xf32>
    %c0_1 = arith.constant 0 : index
    %c0_2 = arith.constant 0 : index
    %1 = vector.load %arg2[%c0_1, %c0_2] : memref<32x64xf32, #tpu.memory_space<vmem>>, vector<32x64xf32>
    %cst = arith.constant dense<0.000000e+00> : vector<16x64xf32>
    %2 = tpu.matmul %0, %1, %cst {dimension_numbers = #tpu.dot_dimension_numbers<[1], [0], [0], [1], [0, 0, 1, 1], [], []>} : vector<16x32xf32>, vector<32x64xf32>, vector<16x64xf32> -> vector<16x64xf32>
    %c0_3 = arith.constant 0 : index
    %c0_4 = arith.constant 0 : index
    %3 = vector.load %arg5[%c0_3, %c0_4] : memref<16x64xf32, #tpu.memory_space<vmem>>, vector<16x64xf32>
    tpu.vector_store %arg5[%c0_3, %c0_4], %2 {strides = array<i32>} : memref<16x64xf32, #tpu.memory_space<vmem>>, vector<16x64xf32>,
    %c0_5 = arith.constant 0 : index
    %c0_6 = arith.constant 0 : index
    %4 = vector.load %arg3[%c0_5, %c0_6] : memref<32x64xf32, #tpu.memory_space<vmem>>, vector<32x64xf32>
    %cst_7 = arith.constant dense<0.000000e+00> : vector<16x64xf32>
    %5 = tpu.matmul %0, %4, %cst_7 {dimension_numbers = #tpu.dot_dimension_numbers<[1], [0], [0], [1], [0, 0, 1, 1], [], []>} : vector<16x32xf32>, vector<32x64xf32>, vector<16x64xf32> -> vector<16x64xf32>
    %c0_8 = arith.constant 0 : index
    %c0_9 = arith.constant 0 : index
    %6 = vector.load %arg6[%c0_8, %c0_9] : memref<16x64xf32, #tpu.memory_space<vmem>>, vector<16x64xf32>
    tpu.vector_store %arg6[%c0_8, %c0_9], %5 {strides = array<i32>} : memref<16x64xf32, #tpu.memory_space<vmem>>, vector<16x64xf32>,
    %c0_10 = arith.constant 0 : index
    %c0_11 = arith.constant 0 : index
    %7 = vector.load %arg4[%c0_10, %c0_11] : memref<32x64xf32, #tpu.memory_space<vmem>>, vector<32x64xf32>
    %cst_12 = arith.constant dense<0.000000e+00> : vector<16x64xf32>
    %8 = tpu.matmul %0, %7, %cst_12 {dimension_numbers = #tpu.dot_dimension_numbers<[1], [0], [0], [1], [0, 0, 1, 1], [], []>} : vector<16x32xf32>, vector<32x64xf32>, vector<16x64xf32> -> vector<16x64xf32>
    %c0_13 = arith.constant 0 : index
    %c0_14 = arith.constant 0 : index
    %9 = vector.load %arg7[%c0_13, %c0_14] : memref<16x64xf32, #tpu.memory_space<vmem>>, vector<16x64xf32>
    tpu.vector_store %arg7[%c0_13, %c0_14], %8 {strides = array<i32>} : memref<16x64xf32, #tpu.memory_space<vmem>>, vector<16x64xf32>,
    return
  }
  func.func @transform_0(%arg0: i32) -> (i32, i32) {
    %c0_i32 = arith.constant 0 : i32
    %c0_i32_0 = arith.constant 0 : i32
    return %arg0, %c0_i32 : i32, i32
  }
  func.func @transform_1(%arg0: i32) -> (i32, i32) {
    %c0_i32 = arith.constant 0 : i32
    %c0_i32_0 = arith.constant 0 : i32
    %c0_i32_1 = arith.constant 0 : i32
    return %c0_i32, %c0_i32_0 : i32, i32
  }
  func.func @transform_2(%arg0: i32) -> (i32, i32) {
    %c0_i32 = arith.constant 0 : i32
    %c0_i32_0 = arith.constant 0 : i32
    %c0_i32_1 = arith.constant 0 : i32
    return %c0_i32, %c0_i32_0 : i32, i32
  }
  func.func @transform_3(%arg0: i32) -> (i32, i32) {
    %c0_i32 = arith.constant 0 : i32
    %c0_i32_0 = arith.constant 0 : i32
    %c0_i32_1 = arith.constant 0 : i32
    return %c0_i32, %c0_i32_0 : i32, i32
  }
  func.func @transform_4(%arg0: i32) -> (i32, i32) {
    %c0_i32 = arith.constant 0 : i32
    %c0_i32_0 = arith.constant 0 : i32
    return %arg0, %c0_i32 : i32, i32
  }
  func.func @transform_5(%arg0: i32) -> (i32, i32) {
    %c0_i32 = arith.constant 0 : i32
    %c0_i32_0 = arith.constant 0 : i32
    return %arg0, %c0_i32 : i32, i32
  }
  func.func @transform_6(%arg0: i32) -> (i32, i32) {
    %c0_i32 = arith.constant 0 : i32
    %c0_i32_0 = arith.constant 0 : i32
    return %arg0, %c0_i32 : i32, i32
  }
}

module attributes {stable_mosaic.version = 11 : i64} {
  func.func @_attention_kernel(%arg0: i32, %arg1: memref<8x64xf32, #tpu.memory_space<vmem>>, %arg2: memref<8x64xf32, #tpu.memory_space<vmem>>, %arg3: memref<8x64xf32, #tpu.memory_space<vmem>>, %arg4: memref<8x64xf32, #tpu.memory_space<vmem>>) attributes {dimension_semantics = [#tpu.dimension_semantics<parallel>], iteration_bounds = array<i64: 2>, scalar_prefetch = 0 : i64, scratch_operands = 0 : i64, tpu.core_type = #tpu.core_type<tc>, window_params = [{transform_indices = @transform_0, window_bounds = array<i64: 8, 64>}, {transform_indices = @transform_1, window_bounds = array<i64: 8, 64>}, {transform_indices = @transform_2, window_bounds = array<i64: 8, 64>}, {transform_indices = @transform_3, window_bounds = array<i64: 8, 64>}]} {
    %c0 = arith.constant 0 : index
    %c0_0 = arith.constant 0 : index
    %0 = vector.load %arg1[%c0, %c0_0] : memref<8x64xf32, #tpu.memory_space<vmem>>, vector<8x64xf32>
    %c0_1 = arith.constant 0 : index
    %c0_2 = arith.constant 0 : index
    %1 = vector.load %arg2[%c0_1, %c0_2] : memref<8x64xf32, #tpu.memory_space<vmem>>, vector<8x64xf32>
    %c0_3 = arith.constant 0 : index
    %c0_4 = arith.constant 0 : index
    %2 = vector.load %arg3[%c0_3, %c0_4] : memref<8x64xf32, #tpu.memory_space<vmem>>, vector<8x64xf32>
    %3 = vector.extract_strided_slice %0 {offsets = [0, 0], sizes = [8, 32], strides = [1, 1]} : vector<8x64xf32> to vector<8x32xf32>
    %4 = vector.extract_strided_slice %1 {offsets = [0, 0], sizes = [8, 32], strides = [1, 1]} : vector<8x64xf32> to vector<8x32xf32>
    %5 = vector.extract_strided_slice %2 {offsets = [0, 0], sizes = [8, 32], strides = [1, 1]} : vector<8x64xf32> to vector<8x32xf32>
    %cst = arith.constant dense<0.000000e+00> : vector<8x8xf32>
    %6 = tpu.matmul %3, %4, %cst {dimension_numbers = #tpu.dot_dimension_numbers<[1], [1], [0], [0], [0, 0, 1, 0], [], []>} : vector<8x32xf32>, vector<8x32xf32>, vector<8x8xf32> -> vector<8x8xf32>
    %cst_5 = arith.constant dense<0xFF800000> : vector<8xf32>
    %7 = vector.multi_reduction <maximumf>, %6, %cst_5 [1] : vector<8x8xf32> to vector<8xf32>
    %8 = vector.shape_cast %7 : vector<8xf32> to vector<8x1xf32>
    %9 = vector.broadcast %8 : vector<8x1xf32> to vector<8x8xf32>
    %10 = arith.subf %6, %9 : vector<8x8xf32>
    %11 = math.exp %10 : vector<8x8xf32>
    %cst_6 = arith.constant dense<0.000000e+00> : vector<8xf32>
    %12 = vector.multi_reduction <add>, %11, %cst_6 [1] : vector<8x8xf32> to vector<8xf32>
    %13 = vector.shape_cast %12 : vector<8xf32> to vector<8x1xf32>
    %14 = tpu.reciprocal %13 {approx = true} : vector<8x1xf32> -> vector<8x1xf32>
    %15 = vector.broadcast %14 : vector<8x1xf32> to vector<8x8xf32>
    %16 = arith.mulf %11, %15 : vector<8x8xf32>
    %cst_7 = arith.constant dense<0.000000e+00> : vector<8x32xf32>
    %17 = tpu.matmul %16, %5, %cst_7 {dimension_numbers = #tpu.dot_dimension_numbers<[1], [0], [0], [1], [0, 0, 1, 1], [], []>} : vector<8x8xf32>, vector<8x32xf32>, vector<8x32xf32> -> vector<8x32xf32>
    %18 = vector.extract_strided_slice %0 {offsets = [0, 32], sizes = [8, 32], strides = [1, 1]} : vector<8x64xf32> to vector<8x32xf32>
    %19 = vector.extract_strided_slice %1 {offsets = [0, 32], sizes = [8, 32], strides = [1, 1]} : vector<8x64xf32> to vector<8x32xf32>
    %20 = vector.extract_strided_slice %2 {offsets = [0, 32], sizes = [8, 32], strides = [1, 1]} : vector<8x64xf32> to vector<8x32xf32>
    %cst_8 = arith.constant dense<0.000000e+00> : vector<8x8xf32>
    %21 = tpu.matmul %18, %19, %cst_8 {dimension_numbers = #tpu.dot_dimension_numbers<[1], [1], [0], [0], [0, 0, 1, 0], [], []>} : vector<8x32xf32>, vector<8x32xf32>, vector<8x8xf32> -> vector<8x8xf32>
    %cst_9 = arith.constant dense<0xFF800000> : vector<8xf32>
    %22 = vector.multi_reduction <maximumf>, %21, %cst_9 [1] : vector<8x8xf32> to vector<8xf32>
    %23 = vector.shape_cast %22 : vector<8xf32> to vector<8x1xf32>
    %24 = vector.broadcast %23 : vector<8x1xf32> to vector<8x8xf32>
    %25 = arith.subf %21, %24 : vector<8x8xf32>
    %26 = math.exp %25 : vector<8x8xf32>
    %cst_10 = arith.constant dense<0.000000e+00> : vector<8xf32>
    %27 = vector.multi_reduction <add>, %26, %cst_10 [1] : vector<8x8xf32> to vector<8xf32>
    %28 = vector.shape_cast %27 : vector<8xf32> to vector<8x1xf32>
    %29 = tpu.reciprocal %28 {approx = true} : vector<8x1xf32> -> vector<8x1xf32>
    %30 = vector.broadcast %29 : vector<8x1xf32> to vector<8x8xf32>
    %31 = arith.mulf %26, %30 : vector<8x8xf32>
    %cst_11 = arith.constant dense<0.000000e+00> : vector<8x32xf32>
    %32 = tpu.matmul %31, %20, %cst_11 {dimension_numbers = #tpu.dot_dimension_numbers<[1], [0], [0], [1], [0, 0, 1, 1], [], []>} : vector<8x8xf32>, vector<8x32xf32>, vector<8x32xf32> -> vector<8x32xf32>
    %33 = tpu.concatenate %17, %32 in 1 : vector<8x32xf32>, vector<8x32xf32> -> vector<8x64xf32>
    %c0_12 = arith.constant 0 : index
    %c0_13 = arith.constant 0 : index
    %34 = vector.load %arg4[%c0_12, %c0_13] : memref<8x64xf32, #tpu.memory_space<vmem>>, vector<8x64xf32>
    tpu.vector_store %arg4[%c0_12, %c0_13], %33 {strides = array<i32>} : memref<8x64xf32, #tpu.memory_space<vmem>>, vector<8x64xf32>,
    return
  }
  func.func @transform_0(%arg0: i32) -> (i32, i32) {
    %c0_i32 = arith.constant 0 : i32
    %c0_i32_0 = arith.constant 0 : i32
    return %arg0, %c0_i32 : i32, i32
  }
  func.func @transform_1(%arg0: i32) -> (i32, i32) {
    %c0_i32 = arith.constant 0 : i32
    %c0_i32_0 = arith.constant 0 : i32
    return %arg0, %c0_i32 : i32, i32
  }
  func.func @transform_2(%arg0: i32) -> (i32, i32) {
    %c0_i32 = arith.constant 0 : i32
    %c0_i32_0 = arith.constant 0 : i32
    return %arg0, %c0_i32 : i32, i32
  }
  func.func @transform_3(%arg0: i32) -> (i32, i32) {
    %c0_i32 = arith.constant 0 : i32
    %c0_i32_0 = arith.constant 0 : i32
    return %arg0, %c0_i32 : i32, i32
  }
}

module attributes {stable_mosaic.version = 11 : i64} {
  func.func @kernel(%arg0: i32, %arg1: memref<16x32xf32, #tpu.memory_space<vmem>>, %arg2: memref<32x64xf32, #tpu.memory_space<vmem>>, %arg3: memref<16x64xf32, #tpu.memory_space<vmem>>) attributes {dimension_semantics = [#tpu.dimension_semantics<parallel>], iteration_bounds = array<i64: 1>, scalar_prefetch = 0 : i64, scratch_operands = 0 : i64, tpu.core_type = #tpu.core_type<tc>, window_params = [{transform_indices = @transform_0, window_bounds = array<i64: 16, 32>}, {pipeline_mode = #tpu.pipeline_mode<synchronous>, transform_indices = @transform_1, window_bounds = array<i64: 32, 64>}, {transform_indices = @transform_2, window_bounds = array<i64: 16, 64>}]} {
    %c0 = arith.constant 0 : index
    %c0_0 = arith.constant 0 : index
    %0 = vector.load %arg1[%c0, %c0_0] : memref<16x32xf32, #tpu.memory_space<vmem>>, vector<16x32xf32>
    %c0_1 = arith.constant 0 : index
    %c0_2 = arith.constant 0 : index
    %1 = vector.load %arg2[%c0_1, %c0_2] : memref<32x64xf32, #tpu.memory_space<vmem>>, vector<32x64xf32>
    %cst = arith.constant dense<0.000000e+00> : vector<16x64xf32>
    %2 = tpu.matmul %0, %1, %cst {dimension_numbers = #tpu.dot_dimension_numbers<[1], [0], [0], [1], [0, 0, 1, 1], [], []>} : vector<16x32xf32>, vector<32x64xf32>, vector<16x64xf32> -> vector<16x64xf32>
    %c0_3 = arith.constant 0 : index
    %c0_4 = arith.constant 0 : index
    %3 = vector.load %arg3[%c0_3, %c0_4] : memref<16x64xf32, #tpu.memory_space<vmem>>, vector<16x64xf32>
    tpu.vector_store %arg3[%c0_3, %c0_4], %2 {strides = array<i32>} : memref<16x64xf32, #tpu.memory_space<vmem>>, vector<16x64xf32>,
    return
  }
  func.func @transform_0(%arg0: i32) -> (i32, i32) {
    %c0_i32 = arith.constant 0 : i32
    %c0_i32_0 = arith.constant 0 : i32
    return %arg0, %c0_i32 : i32, i32
  }
  func.func @transform_1(%arg0: i32) -> (i32, i32) {
    %c0_i32 = arith.constant 0 : i32
    %c0_i32_0 = arith.constant 0 : i32
    %c0_i32_1 = arith.constant 0 : i32
    return %c0_i32, %c0_i32_0 : i32, i32
  }
  func.func @transform_2(%arg0: i32) -> (i32, i32) {
    %c0_i32 = arith.constant 0 : i32
    %c0_i32_0 = arith.constant 0 : i32
    return %arg0, %c0_i32 : i32, i32
  }
}

module attributes {stable_mosaic.version = 11 : i64} {
  func.func @kernel(%arg0: i32, %arg1: memref<32x32xf32, #tpu.memory_space<vmem>>, %arg2: memref<32x64xf32, #tpu.memory_space<vmem>>, %arg3: memref<32x64xf32, #tpu.memory_space<vmem>>, %arg4: memref<32x64xf32, #tpu.memory_space<vmem>>, %arg5: memref<32x64xf32, #tpu.memory_space<vmem>>) attributes {dimension_semantics = [#tpu.dimension_semantics<parallel>], iteration_bounds = array<i64: 1>, scalar_prefetch = 0 : i64, scratch_operands = 0 : i64, tpu.core_type = #tpu.core_type<tc>, window_params = [{transform_indices = @transform_0, window_bounds = array<i64: 32, 32>}, {pipeline_mode = #tpu.pipeline_mode<synchronous>, transform_indices = @transform_1, window_bounds = array<i64: 32, 64>}, {pipeline_mode = #tpu.pipeline_mode<synchronous>, transform_indices = @transform_2, window_bounds = array<i64: 32, 64>}, {transform_indices = @transform_3, window_bounds = array<i64: 32, 64>}, {transform_indices = @transform_4, window_bounds = array<i64: 32, 64>}]} {
    %c0 = arith.constant 0 : index
    %c0_0 = arith.constant 0 : index
    %0 = vector.load %arg1[%c0, %c0_0] : memref<32x32xf32, #tpu.memory_space<vmem>>, vector<32x32xf32>
    %c0_1 = arith.constant 0 : index
    %c0_2 = arith.constant 0 : index
    %1 = vector.load %arg2[%c0_1, %c0_2] : memref<32x64xf32, #tpu.memory_space<vmem>>, vector<32x64xf32>
    %cst = arith.constant dense<0.000000e+00> : vector<32x64xf32>
    %2 = tpu.matmul %0, %1, %cst {dimension_numbers = #tpu.dot_dimension_numbers<[1], [0], [0], [1], [0, 0, 1, 1], [], []>} : vector<32x32xf32>, vector<32x64xf32>, vector<32x64xf32> -> vector<32x64xf32>
    %c0_3 = arith.constant 0 : index
    %c0_4 = arith.constant 0 : index
    %3 = vector.load %arg4[%c0_3, %c0_4] : memref<32x64xf32, #tpu.memory_space<vmem>>, vector<32x64xf32>
    tpu.vector_store %arg4[%c0_3, %c0_4], %2 {strides = array<i32>} : memref<32x64xf32, #tpu.memory_space<vmem>>, vector<32x64xf32>,
    %c0_5 = arith.constant 0 : index
    %c0_6 = arith.constant 0 : index
    %4 = vector.load %arg3[%c0_5, %c0_6] : memref<32x64xf32, #tpu.memory_space<vmem>>, vector<32x64xf32>
    %cst_7 = arith.constant dense<0.000000e+00> : vector<32x64xf32>
    %5 = tpu.matmul %0, %4, %cst_7 {dimension_numbers = #tpu.dot_dimension_numbers<[1], [0], [0], [1], [0, 0, 1, 1], [], []>} : vector<32x32xf32>, vector<32x64xf32>, vector<32x64xf32> -> vector<32x64xf32>
    %c0_8 = arith.constant 0 : index
    %c0_9 = arith.constant 0 : index
    %6 = vector.load %arg5[%c0_8, %c0_9] : memref<32x64xf32, #tpu.memory_space<vmem>>, vector<32x64xf32>
    tpu.vector_store %arg5[%c0_8, %c0_9], %5 {strides = array<i32>} : memref<32x64xf32, #tpu.memory_space<vmem>>, vector<32x64xf32>,
    return
  }
  func.func @transform_0(%arg0: i32) -> (i32, i32) {
    %c0_i32 = arith.constant 0 : i32
    %c0_i32_0 = arith.constant 0 : i32
    return %arg0, %c0_i32 : i32, i32
  }
  func.func @transform_1(%arg0: i32) -> (i32, i32) {
    %c0_i32 = arith.constant 0 : i32
    %c0_i32_0 = arith.constant 0 : i32
    %c0_i32_1 = arith.constant 0 : i32
    return %c0_i32, %c0_i32_0 : i32, i32
  }
  func.func @transform_2(%arg0: i32) -> (i32, i32) {
    %c0_i32 = arith.constant 0 : i32
    %c0_i32_0 = arith.constant 0 : i32
    %c0_i32_1 = arith.constant 0 : i32
    return %c0_i32, %c0_i32_0 : i32, i32
  }
  func.func @transform_3(%arg0: i32) -> (i32, i32) {
    %c0_i32 = arith.constant 0 : i32
    %c0_i32_0 = arith.constant 0 : i32
    return %arg0, %c0_i32 : i32, i32
  }
  func.func @transform_4(%arg0: i32) -> (i32, i32) {
    %c0_i32 = arith.constant 0 : i32
    %c0_i32_0 = arith.constant 0 : i32
    return %arg0, %c0_i32 : i32, i32
  }
}

module attributes {stable_mosaic.version = 11 : i64} {
  func.func @_attention_kernel(%arg0: i32, %arg1: memref<8x64xf32, #tpu.memory_space<vmem>>, %arg2: memref<16x64xf32, #tpu.memory_space<vmem>>, %arg3: memref<16x64xf32, #tpu.memory_space<vmem>>, %arg4: memref<8x64xf32, #tpu.memory_space<vmem>>) attributes {dimension_semantics = [#tpu.dimension_semantics<parallel>], iteration_bounds = array<i64: 2>, scalar_prefetch = 0 : i64, scratch_operands = 0 : i64, tpu.core_type = #tpu.core_type<tc>, window_params = [{transform_indices = @transform_0, window_bounds = array<i64: 8, 64>}, {transform_indices = @transform_1, window_bounds = array<i64: 16, 64>}, {transform_indices = @transform_2, window_bounds = array<i64: 16, 64>}, {transform_indices = @transform_3, window_bounds = array<i64: 8, 64>}]} {
    %c0 = arith.constant 0 : index
    %c0_0 = arith.constant 0 : index
    %0 = vector.load %arg1[%c0, %c0_0] : memref<8x64xf32, #tpu.memory_space<vmem>>, vector<8x64xf32>
    %c0_1 = arith.constant 0 : index
    %c0_2 = arith.constant 0 : index
    %1 = vector.load %arg2[%c0_1, %c0_2] : memref<16x64xf32, #tpu.memory_space<vmem>>, vector<16x64xf32>
    %c0_3 = arith.constant 0 : index
    %c0_4 = arith.constant 0 : index
    %2 = vector.load %arg3[%c0_3, %c0_4] : memref<16x64xf32, #tpu.memory_space<vmem>>, vector<16x64xf32>
    %3 = vector.extract_strided_slice %0 {offsets = [0, 0], sizes = [8, 32], strides = [1, 1]} : vector<8x64xf32> to vector<8x32xf32>
    %4 = vector.extract_strided_slice %1 {offsets = [0, 0], sizes = [16, 32], strides = [1, 1]} : vector<16x64xf32> to vector<16x32xf32>
    %5 = vector.extract_strided_slice %2 {offsets = [0, 0], sizes = [16, 32], strides = [1, 1]} : vector<16x64xf32> to vector<16x32xf32>
    %cst = arith.constant dense<0.000000e+00> : vector<8x16xf32>
    %6 = tpu.matmul %3, %4, %cst {dimension_numbers = #tpu.dot_dimension_numbers<[1], [1], [0], [0], [0, 0, 1, 0], [], []>} : vector<8x32xf32>, vector<16x32xf32>, vector<8x16xf32> -> vector<8x16xf32>
    %cst_5 = arith.constant dense<0xFF800000> : vector<8xf32>
    %7 = vector.multi_reduction <maximumf>, %6, %cst_5 [1] : vector<8x16xf32> to vector<8xf32>
    %8 = vector.shape_cast %7 : vector<8xf32> to vector<8x1xf32>
    %9 = vector.broadcast %8 : vector<8x1xf32> to vector<8x16xf32>
    %10 = arith.subf %6, %9 : vector<8x16xf32>
    %11 = math.exp %10 : vector<8x16xf32>
    %cst_6 = arith.constant dense<0.000000e+00> : vector<8xf32>
    %12 = vector.multi_reduction <add>, %11, %cst_6 [1] : vector<8x16xf32> to vector<8xf32>
    %13 = vector.shape_cast %12 : vector<8xf32> to vector<8x1xf32>
    %14 = tpu.reciprocal %13 {approx = true} : vector<8x1xf32> -> vector<8x1xf32>
    %15 = vector.broadcast %14 : vector<8x1xf32> to vector<8x16xf32>
    %16 = arith.mulf %11, %15 : vector<8x16xf32>
    %cst_7 = arith.constant dense<0.000000e+00> : vector<8x32xf32>
    %17 = tpu.matmul %16, %5, %cst_7 {dimension_numbers = #tpu.dot_dimension_numbers<[1], [0], [0], [1], [0, 0, 1, 1], [], []>} : vector<8x16xf32>, vector<16x32xf32>, vector<8x32xf32> -> vector<8x32xf32>
    %18 = vector.extract_strided_slice %0 {offsets = [0, 32], sizes = [8, 32], strides = [1, 1]} : vector<8x64xf32> to vector<8x32xf32>
    %19 = vector.extract_strided_slice %1 {offsets = [0, 32], sizes = [16, 32], strides = [1, 1]} : vector<16x64xf32> to vector<16x32xf32>
    %20 = vector.extract_strided_slice %2 {offsets = [0, 32], sizes = [16, 32], strides = [1, 1]} : vector<16x64xf32> to vector<16x32xf32>
    %cst_8 = arith.constant dense<0.000000e+00> : vector<8x16xf32>
    %21 = tpu.matmul %18, %19, %cst_8 {dimension_numbers = #tpu.dot_dimension_numbers<[1], [1], [0], [0], [0, 0, 1, 0], [], []>} : vector<8x32xf32>, vector<16x32xf32>, vector<8x16xf32> -> vector<8x16xf32>
    %cst_9 = arith.constant dense<0xFF800000> : vector<8xf32>
    %22 = vector.multi_reduction <maximumf>, %21, %cst_9 [1] : vector<8x16xf32> to vector<8xf32>
    %23 = vector.shape_cast %22 : vector<8xf32> to vector<8x1xf32>
    %24 = vector.broadcast %23 : vector<8x1xf32> to vector<8x16xf32>
    %25 = arith.subf %21, %24 : vector<8x16xf32>
    %26 = math.exp %25 : vector<8x16xf32>
    %cst_10 = arith.constant dense<0.000000e+00> : vector<8xf32>
    %27 = vector.multi_reduction <add>, %26, %cst_10 [1] : vector<8x16xf32> to vector<8xf32>
    %28 = vector.shape_cast %27 : vector<8xf32> to vector<8x1xf32>
    %29 = tpu.reciprocal %28 {approx = true} : vector<8x1xf32> -> vector<8x1xf32>
    %30 = vector.broadcast %29 : vector<8x1xf32> to vector<8x16xf32>
    %31 = arith.mulf %26, %30 : vector<8x16xf32>
    %cst_11 = arith.constant dense<0.000000e+00> : vector<8x32xf32>
    %32 = tpu.matmul %31, %20, %cst_11 {dimension_numbers = #tpu.dot_dimension_numbers<[1], [0], [0], [1], [0, 0, 1, 1], [], []>} : vector<8x16xf32>, vector<16x32xf32>, vector<8x32xf32> -> vector<8x32xf32>
    %33 = tpu.concatenate %17, %32 in 1 : vector<8x32xf32>, vector<8x32xf32> -> vector<8x64xf32>
    %c0_12 = arith.constant 0 : index
    %c0_13 = arith.constant 0 : index
    %34 = vector.load %arg4[%c0_12, %c0_13] : memref<8x64xf32, #tpu.memory_space<vmem>>, vector<8x64xf32>
    tpu.vector_store %arg4[%c0_12, %c0_13], %33 {strides = array<i32>} : memref<8x64xf32, #tpu.memory_space<vmem>>, vector<8x64xf32>,
    return
  }
  func.func @transform_0(%arg0: i32) -> (i32, i32) {
    %c0_i32 = arith.constant 0 : i32
    %c0_i32_0 = arith.constant 0 : i32
    return %arg0, %c0_i32 : i32, i32
  }
  func.func @transform_1(%arg0: i32) -> (i32, i32) {
    %c0_i32 = arith.constant 0 : i32
    %c0_i32_0 = arith.constant 0 : i32
    return %arg0, %c0_i32 : i32, i32
  }
  func.func @transform_2(%arg0: i32) -> (i32, i32) {
    %c0_i32 = arith.constant 0 : i32
    %c0_i32_0 = arith.constant 0 : i32
    return %arg0, %c0_i32 : i32, i32
  }
  func.func @transform_3(%arg0: i32) -> (i32, i32) {
    %c0_i32 = arith.constant 0 : i32
    %c0_i32_0 = arith.constant 0 : i32
    return %arg0, %c0_i32 : i32, i32
  }
}

module attributes {stable_mosaic.version = 11 : i64} {
  func.func @_ffn_add_ln_kernel(%arg0: i32, %arg1: memref<16x32xf32, #tpu.memory_space<vmem>>, %arg2: memref<32x64xf32, #tpu.memory_space<vmem>>, %arg3: memref<1x64xf32, #tpu.memory_space<vmem>>, %arg4: memref<64x32xf32, #tpu.memory_space<vmem>>, %arg5: memref<1x32xf32, #tpu.memory_space<vmem>>, %arg6: memref<1x32xf32, #tpu.memory_space<vmem>>, %arg7: memref<1x32xf32, #tpu.memory_space<vmem>>, %arg8: memref<16x32xf32, #tpu.memory_space<vmem>>) attributes {dimension_semantics = [#tpu.dimension_semantics<parallel>], iteration_bounds = array<i64: 1>, scalar_prefetch = 0 : i64, scratch_operands = 0 : i64, tpu.core_type = #tpu.core_type<tc>, window_params = [{transform_indices = @transform_0, window_bounds = array<i64: 16, 32>}, {pipeline_mode = #tpu.pipeline_mode<synchronous>, transform_indices = @transform_1, window_bounds = array<i64: 32, 64>}, {pipeline_mode = #tpu.pipeline_mode<synchronous>, transform_indices = @transform_2, window_bounds = array<i64: 1, 64>}, {pipeline_mode = #tpu.pipeline_mode<synchronous>, transform_indices = @transform_3, window_bounds = array<i64: 64, 32>}, {pipeline_mode = #tpu.pipeline_mode<synchronous>, transform_indices = @transform_4, window_bounds = array<i64: 1, 32>}, {pipeline_mode = #tpu.pipeline_mode<synchronous>, transform_indices = @transform_5, window_bounds = array<i64: 1, 32>}, {pipeline_mode = #tpu.pipeline_mode<synchronous>, transform_indices = @transform_6, window_bounds = array<i64: 1, 32>}, {transform_indices = @transform_7, window_bounds = array<i64: 16, 32>}]} {
    %c0 = arith.constant 0 : index
    %c0_0 = arith.constant 0 : index
    %0 = vector.load %arg1[%c0, %c0_0] : memref<16x32xf32, #tpu.memory_space<vmem>>, vector<16x32xf32>
    %c0_1 = arith.constant 0 : index
    %c0_2 = arith.constant 0 : index
    %1 = vector.load %arg2[%c0_1, %c0_2] : memref<32x64xf32, #tpu.memory_space<vmem>>, vector<32x64xf32>
    %cst = arith.constant dense<0.000000e+00> : vector<16x64xf32>
    %2 = tpu.matmul %0, %1, %cst {dimension_numbers = #tpu.dot_dimension_numbers<[1], [0], [0], [1], [0, 0, 1, 1], [], []>} : vector<16x32xf32>, vector<32x64xf32>, vector<16x64xf32> -> vector<16x64xf32>
    %c0_3 = arith.constant 0 : index
    %c0_4 = arith.constant 0 : index
    %3 = vector.load %arg3[%c0_3, %c0_4] : memref<1x64xf32, #tpu.memory_space<vmem>>, vector<1x64xf32>
    %4 = vector.broadcast %3 : vector<1x64xf32> to vector<16x64xf32>
    %5 = arith.addf %2, %4 : vector<16x64xf32>
    %cst_5 = arith.constant 0.000000e+00 : f32
    %6 = vector.broadcast %cst_5 : f32 to vector<16x64xf32>
    %7 = arith.maximumf %5, %6 : vector<16x64xf32>
    %c0_6 = arith.constant 0 : index
    %c0_7 = arith.constant 0 : index
    %8 = vector.load %arg4[%c0_6, %c0_7] : memref<64x32xf32, #tpu.memory_space<vmem>>, vector<64x32xf32>
    %cst_8 = arith.constant dense<0.000000e+00> : vector<16x32xf32>
    %9 = tpu.matmul %7, %8, %cst_8 {dimension_numbers = #tpu.dot_dimension_numbers<[1], [0], [0], [1], [0, 0, 1, 1], [], []>} : vector<16x64xf32>, vector<64x32xf32>, vector<16x32xf32> -> vector<16x32xf32>
    %c0_9 = arith.constant 0 : index
    %c0_10 = arith.constant 0 : index
    %10 = vector.load %arg5[%c0_9, %c0_10] : memref<1x32xf32, #tpu.memory_space<vmem>>, vector<1x32xf32>
    %11 = vector.broadcast %10 : vector<1x32xf32> to vector<16x32xf32>
    %12 = arith.addf %9, %11 : vector<16x32xf32>
    %13 = arith.addf %12, %0 : vector<16x32xf32>
    %cst_11 = arith.constant dense<0.000000e+00> : vector<16xf32>
    %14 = vector.multi_reduction <add>, %13, %cst_11 [1] : vector<16x32xf32> to vector<16xf32>
    %15 = vector.shape_cast %14 : vector<16xf32> to vector<16x1xf32>
    %cst_12 = arith.constant 3.200000e+01 : f32
    %16 = vector.broadcast %cst_12 : f32 to vector<16x1xf32>
    %17 = arith.divf %15, %16 : vector<16x1xf32>
    %18 = vector.broadcast %17 : vector<16x1xf32> to vector<16x32xf32>
    %19 = arith.subf %13, %18 : vector<16x32xf32>
    %20 = arith.mulf %19, %19 : vector<16x32xf32>
    %cst_13 = arith.constant dense<0.000000e+00> : vector<16xf32>
    %21 = vector.multi_reduction <add>, %20, %cst_13 [1] : vector<16x32xf32> to vector<16xf32>
    %22 = vector.shape_cast %21 : vector<16xf32> to vector<16x1xf32>
    %cst_14 = arith.constant 3.200000e+01 : f32
    %23 = vector.broadcast %cst_14 : f32 to vector<16x1xf32>
    %24 = arith.divf %22, %23 : vector<16x1xf32>
    %cst_15 = arith.constant 9.99999974E-6 : f32
    %25 = vector.broadcast %cst_15 : f32 to vector<16x1xf32>
    %26 = arith.addf %24, %25 : vector<16x1xf32>
    %27 = math.rsqrt %26 : vector<16x1xf32>
    %28 = vector.broadcast %27 : vector<16x1xf32> to vector<16x32xf32>
    %29 = arith.mulf %19, %28 : vector<16x32xf32>
    %c0_16 = arith.constant 0 : index
    %c0_17 = arith.constant 0 : index
    %30 = vector.load %arg6[%c0_16, %c0_17] : memref<1x32xf32, #tpu.memory_space<vmem>>, vector<1x32xf32>
    %31 = vector.broadcast %30 : vector<1x32xf32> to vector<16x32xf32>
    %32 = arith.mulf %29, %31 : vector<16x32xf32>
    %c0_18 = arith.constant 0 : index
    %c0_19 = arith.constant 0 : index
    %33 = vector.load %arg7[%c0_18, %c0_19] : memref<1x32xf32, #tpu.memory_space<vmem>>, vector<1x32xf32>
    %34 = vector.broadcast %33 : vector<1x32xf32> to vector<16x32xf32>
    %35 = arith.addf %32, %34 : vector<16x32xf32>
    %c0_20 = arith.constant 0 : index
    %c0_21 = arith.constant 0 : index
    %36 = vector.load %arg8[%c0_20, %c0_21] : memref<16x32xf32, #tpu.memory_space<vmem>>, vector<16x32xf32>
    tpu.vector_store %arg8[%c0_20, %c0_21], %35 {strides = array<i32>} : memref<16x32xf32, #tpu.memory_space<vmem>>, vector<16x32xf32>,
    return
  }
  func.func @transform_0(%arg0: i32) -> (i32, i32) {
    %c0_i32 = arith.constant 0 : i32
    %c0_i32_0 = arith.constant 0 : i32
    return %arg0, %c0_i32 : i32, i32
  }
  func.func @transform_1(%arg0: i32) -> (i32, i32) {
    %c0_i32 = arith.constant 0 : i32
    %c0_i32_0 = arith.constant 0 : i32
    %c0_i32_1 = arith.constant 0 : i32
    return %c0_i32, %c0_i32_0 : i32, i32
  }
  func.func @transform_2(%arg0: i32) -> (i32, i32) {
    %c0_i32 = arith.constant 0 : i32
    %c0_i32_0 = arith.constant 0 : i32
    %c0_i32_1 = arith.constant 0 : i32
    return %c0_i32, %c0_i32_0 : i32, i32
  }
  func.func @transform_3(%arg0: i32) -> (i32, i32) {
    %c0_i32 = arith.constant 0 : i32
    %c0_i32_0 = arith.constant 0 : i32
    %c0_i32_1 = arith.constant 0 : i32
    return %c0_i32, %c0_i32_0 : i32, i32
  }
  func.func @transform_4(%arg0: i32) -> (i32, i32) {
    %c0_i32 = arith.constant 0 : i32
    %c0_i32_0 = arith.constant 0 : i32
    %c0_i32_1 = arith.constant 0 : i32
    return %c0_i32, %c0_i32_0 : i32, i32
  }
  func.func @transform_5(%arg0: i32) -> (i32, i32) {
    %c0_i32 = arith.constant 0 : i32
    %c0_i32_0 = arith.constant 0 : i32
    %c0_i32_1 = arith.constant 0 : i32
    return %c0_i32, %c0_i32_0 : i32, i32
  }
  func.func @transform_6(%arg0: i32) -> (i32, i32) {
    %c0_i32 = arith.constant 0 : i32
    %c0_i32_0 = arith.constant 0 : i32
    %c0_i32_1 = arith.constant 0 : i32
    return %c0_i32, %c0_i32_0 : i32, i32
  }
  func.func @transform_7(%arg0: i32) -> (i32, i32) {
    %c0_i32 = arith.constant 0 : i32
    %c0_i32_0 = arith.constant 0 : i32
    return %arg0, %c0_i32 : i32, i32
  }
}

</mosaic_0001>

<bundles_post_ra>
// kernel: decoder_layer.8
= control target key start
LH: loop header
LB: loop body
LE: loop exit
PB: predicated region body
PF: predicated region fallthrough
CT: control target
= control target key end

     0   :  { %12 = vsyncpa [#allocation3], 0  ;;  %s348_s0 = inlined_call_operand.vmem [shape: f32[16,32], index: 0, kind: input, shape index: {}]   ;;  %s349_s1 = inlined_call_operand.hbm [shape: f32[32,64], index: 1, kind: input, shape index: {}]   ;;  %s350_s2 = inlined_call_operand.hbm [shape: f32[32,64], index: 2, kind: input, shape index: {}]   ;;  %s351_s3 = inlined_call_operand.hbm [shape: f32[32,64], index: 3, kind: input, shape index: {}]   ;;  %s352_s4 = inlined_call_operand.vmem [shape: f32[16,64], index: 4, kind: output, shape index: {0}]   ;;  %s353_s5 = inlined_call_operand.vmem [shape: f32[16,64], index: 5, kind: output, shape index: {1}]   ;;  %s354_s6 = inlined_call_operand.vmem [shape: f32[16,64], index: 6, kind: output, shape index: {2}]  }
   0x1   :  { %13 = vsyncpa [#allocation5], 0  ;;  %s33_s23 = sshll.u32 %s350_s2, 4  ;;  %s269_s24 = smov [#allocation4]   ;;  %s34_s23 = int_to_ptr.hbm [resolvable:$true] %s33_s23 }
   0x2   :  { %s35_s25 = sshll.u32 %s269_s24, 4  ;;  %s20_s28 = sshll.u32 %s349_s1, 4  ;;  %s36_s25 = int_to_ptr.vmem [resolvable:$true] %s35_s25  ;;  %s21_s28 = int_to_ptr.hbm [resolvable:$true] %s20_s28 }
   0x3   :  { %s270_s29 = smov 128   ;;  %s271_s30 = smov 8  }
   0x4   :  { %41 = dma.hbm_to_vmem [thread:$0]  %s34_s23, 512, %s36_s25, [#allocation5], %s270_s29, %s270_s29, %s271_s30  }
   0x5   :  { %s272_s7 = smov [#allocation2]   ;;  %s46_s11 = sshll.u32 %s351_s3, 4  ;;  %s47_s11 = int_to_ptr.hbm [resolvable:$true] %s46_s11 }
   0x6   :  { %s22_s8 = sshll.u32 %s272_s7, 4  ;;  %s273_s2 = smov [#allocation6]   ;;  %s23_s8 = int_to_ptr.vmem [resolvable:$true] %s22_s8 }
   0x7   :  { %28 = dma.hbm_to_vmem [thread:$0]  %s21_s28, 512, %s23_s8, [#allocation3], %s270_s29, %s270_s29, %s271_s30  }
   0x8   :  { %s48_s12 = sshll.u32 %s273_s2, 4  ;;  %s49_s12 = int_to_ptr.vmem [resolvable:$true] %s48_s12 }
   0x9   :  { %54 = dma.hbm_to_vmem [thread:$0]  %s47_s11, 512, %s49_s12, [#allocation5], %s270_s29, %s270_s29, %s271_s30  }
   0xa   :  { %265 = dma.done.wait [#allocation3], 512  }
   0xb   :  { %266 = vsyncadd [#allocation3], 4294966784 }
   0xc   :  { %267 = dma.done.wait [#allocation5], 1024  }
   0xd   :  { %268 = vsyncadd [#allocation5], 4294966272  ;;  %v138_v0 = vld [vmem:[#allocation6 + $0x18] sm:$0xff]  ;;  %v137_v1 = vld [vmem:[#allocation6 + $0x10] sm:$0xff]  ;;  %vm73_vm0 = vcmask 261120   ;;  %vm103_vm1 = vcmask 523264  }
   0xe   :  { %151 = vmatpush.msra.mxu2 %v138_v0  ;;  %v136_v2 = vld [vmem:[#allocation6 + $0x8] sm:$0xff]  ;;  %v109_v3 = vld [vmem:[#allocation4 + $0x18] sm:$0xff]  ;;  %v108_v5 = vld [vmem:[#allocation4 + $0x10] sm:$0xff] }
   0xf   :  { %122 = vmatpush.msra.mxu1 %v109_v3  ;;  %v72_v4 = vld [vmem:[#allocation2 + $0x18] sm:$0xff]  ;;  %v71_v6 = vld [vmem:[#allocation2 + $0x10] sm:$0xff]  ;;  %v107_v7 = vld [vmem:[#allocation4 + $0x8] sm:$0xff] }
  0x10   :  { %152 = vmatpush.msra.mxu2 %v137_v1  ;;  %184 = vmatpush.msra.mxu3 %v72_v4  ;;  %v135_v8 = vld [vmem:[#allocation6] sm:$0xff]  ;;  %v70_v9 = vld [vmem:[#allocation2 + $0x8] sm:$0xff] }
  0x11   :  { %123 = vmatpush.msra.mxu1 %v108_v5  ;;  %92 = vmatpush.msra.mxu0 %v72_v4  ;;  %v67_v10 = vld [vmem:[%s348_s0] sm:$0xff]  ;;  %v68_v13 = vld [vmem:[%s348_s0 + $0x8] sm:$0xff] }
  0x12   :  { %153 = vmatpush.msra.mxu2 %v136_v2  ;;  %185 = vmatpush.msra.mxu3 %v71_v6  ;;  %v106_v11 = vld [vmem:[#allocation4] sm:$0xff] }
  0x13   :  { %124 = vmatpush.msra.mxu1 %v107_v7  ;;  %v69_v12 = vld [vmem:[#allocation2] sm:$0xff]  ;;  %93 = vmatpush.msra.mxu0 %v71_v6 }
  0x14   :  { %154 = vmatpush.msra.mxu2 %v135_v8  ;;  %186 = vmatpush.msra.mxu3 %v70_v9 }
  0x15   :  { %182 = vmatmul.msk.f32.vlgmr.msra.gmra.mxu2 %vm73_vm0, %v67_v10  ;;  %125 = vmatpush.msra.mxu1 %v106_v11 }
  0x16   :  { %180 = vmatmul.msk.f32.vlgmr.msra.gmra.mxu1 %vm73_vm0, %v67_v10  ;;  %187 = vmatpush.msra.mxu3 %v69_v12 }
  0x17   :  { %179 = vmatmul.msk.f32.vlgmr.msra.gmra.mxu3 %vm73_vm0, %v68_v13  ;;  %94 = vmatpush.msra.mxu0 %v70_v9 }
  0x19   :  { %95 = vmatpush.msra.mxu0 %v69_v12 }
  0x1a   :  { %178 = vmatmul.msk.f32.vlgmr.msra.gmra.mxu0 %vm73_vm0, %v67_v10 }
  0x1d   :  { %183 = vmatmul.msk.f32.gmra.mxu2 %vm73_vm0, %v68_v13 }
  0x1e   :  { %181 = vmatmul.msk.f32.gmra.mxu1 %vm73_vm0, %v68_v13 }
  0x93   :  { %v127_v14 = vpop.f32.mrf.mxu1 }
  0x94   :  { %133 = vst.msk [vmem:[%s353_s5] sm:$0xff] %vm103_vm1, %v127_v14 }
  0x97   :  { %v97_v15 = vpop.f32.mrf.mxu0 }
  0x98   :  { %v156_v16 = vpop.f32.mrf.mxu2  ;;  %104 = vst.msk [vmem:[%s352_s4] sm:$0xff] %vm103_vm1, %v97_v15 }
  0x99   :  { %162 = vst.msk [vmem:[%s354_s6] sm:$0xff] %vm103_vm1, %v156_v16 }
  0x9a   :  { %v100_v17 = vpop.f32.mrf.mxu3 }
  0x9b   :  { %105 = vst.msk [vmem:[%s352_s4 + $0x8] sm:$0xff] %vm103_vm1, %v100_v17  ;;  %v130_v18 = vpop.f32.mrf.mxu1 }
  0x9c   :  { %134 = vst.msk [vmem:[%s353_s5 + $0x8] sm:$0xff] %vm103_vm1, %v130_v18 }
  0xa0   :  { %v159_v19 = vpop.f32.mrf.mxu2 }
  0xa1   :  { %163 = vst.msk [vmem:[%s354_s6 + $0x8] sm:$0xff] %vm103_vm1, %v159_v19 }
  0xa2   :  { %176 = vsyncpa [#allocation3], 1 }
  0xa3   :  { %177 = vsyncpa [#allocation5], 1 }

// kernel: decoder_layer.10
= control target key start
LH: loop header
LB: loop body
LE: loop exit
PB: predicated region body
PF: predicated region fallthrough
CT: control target
= control target key end

     0   :  { %vm37_vm0 = vcmask 523264   ;;  %vm71_vm1 = vcmask 261120   ;;  %v161_v21 = vmov 32.0   ;;  %s254_s1 = inlined_call_operand.vmem [shape: f32[64,32], index: 1, kind: input, shape index: {}]   ;;  %s255_s2 = inlined_call_operand.vmem [shape: f32[1,32], index: 2, kind: input, shape index: {}]   ;;  %s256_s0 = inlined_call_operand.vmem [shape: f32[16,64], index: 0, kind: input, shape index: {}]   ;;  %s257_s3 = inlined_call_operand.vmem [shape: f32[16,32], index: 3, kind: input, shape index: {}]   ;;  %s258_s4 = inlined_call_operand.vmem [shape: f32[1,32], index: 4, kind: input, shape index: {}]   ;;  %s259_s5 = inlined_call_operand.vmem [shape: f32[1,32], index: 5, kind: input, shape index: {}]   ;;  %s260_s6 = inlined_call_operand.vmem [shape: f32[16,32], index: 6, kind: output, shape index: {}]  }
   0x1   :  { %v32_v0 = vld [vmem:[%s254_s1 + $0x38] sm:$0xff]  ;;  %v31_v1 = vld [vmem:[%s254_s1 + $0x30] sm:$0xff]  ;;  %v30_v2 = vld [vmem:[%s254_s1 + $0x28] sm:$0xff]  ;;  %155 = vrcp.f32 %v161_v21 }
   0x2   :  { %52 = vmatpush.msra.mxu0 %v32_v0  ;;  %143 = vmatpush.msra.mxu1 %v32_v0  ;;  %v29_v3 = vld [vmem:[%s254_s1 + $0x20] sm:$0xff]  ;;  %v28_v4 = vld [vmem:[%s254_s1 + $0x18] sm:$0xff]  ;;  %v27_v5 = vld [vmem:[%s254_s1 + $0x10] sm:$0xff] }
   0x3   :  { %v26_v6 = vld [vmem:[%s254_s1 + $0x8] sm:$0xff]  ;;  %v25_v7 = vld [vmem:[%s254_s1] sm:$0xff] }
   0x4   :  { %53 = vmatpush.msra.mxu0 %v31_v1  ;;  %144 = vmatpush.msra.mxu1 %v31_v1  ;;  %v23_v8 = vld [vmem:[%s256_s0] sm:$0xff]  ;;  %v24_v9 = vld [vmem:[%s256_s0 + $0x8] sm:$0xff] }
   0x5   :  { %v152_v10 = vld [vmem:[%s255_s2] ss:$0 sm:$0xff]  ;;  %v68_v17 = vld [vmem:[%s257_s3 + $0x8] sm:$0xff] }
   0x6   :  { %54 = vmatpush.msra.mxu0 %v30_v2  ;;  %145 = vmatpush.msra.mxu1 %v30_v2  ;;  %v67_v12 = vld [vmem:[%s257_s3] sm:$0xff] }
   0x7   :  { %v156_v22 = vpop.eup %155  ;;  %v153_v52 = vld [vmem:[%s258_s4] ss:$0 sm:$0xff] }
   0x8   :  { %55 = vmatpush.msra.mxu0 %v29_v3  ;;  %146 = vmatpush.msra.mxu1 %v29_v3  ;;  %v79_v23 = vmul.f32 32.0, %v156_v22  ;;  %vm83_vm2 = vweird.f32 %v156_v22  ;;  %v154_v55 = vld [vmem:[%s259_s5] ss:$0 sm:$0xff] }
   0xa   :  { %56 = vmatpush.msra.mxu0 %v28_v4  ;;  %147 = vmatpush.msra.mxu1 %v28_v4  ;;  %v80_v24 = vsub.f32 1.0, %v79_v23 }
   0xc   :  { %57 = vmatpush.msra.mxu0 %v27_v5  ;;  %148 = vmatpush.msra.mxu1 %v27_v5  ;;  %v81_v25 = vmul.f32 %v156_v22, %v80_v24 }
   0xe   :  { %58 = vmatpush.msra.mxu0 %v26_v6  ;;  %149 = vmatpush.msra.mxu1 %v26_v6  ;;  %v82_v26 = vadd.f32 %v156_v22, %v81_v25 }
  0x10   :  { %59 = vmatpush.msra.mxu0 %v25_v7  ;;  %150 = vmatpush.msra.mxu1 %v25_v7  ;;  %v84_v27 = vsel %vm83_vm2, %v156_v22, %v82_v26 }
  0x11   :  { %141 = vmatmul.msk.f32.vlgmr.msra.gmra.mxu0 %vm37_vm0, %v23_v8  ;;  %142 = vmatmul.msk.f32.vlgmr.msra.gmra.mxu1 %vm37_vm0, %v24_v9 }
  0x8e   :  { %v61_v11 = vpop.f32.mrf.mxu0  ;;  %v64_v13 = vpop.f32.mrf.mxu1 }
  0x8f   :  { %v62_v14 = vadd.f32 %v152_v10, %v61_v11  ;;  %v65_v16 = vadd.f32 %v152_v10, %v64_v13 }
  0x91   :  { %v69_v15 = vadd.f32 %v67_v12, %v62_v14  ;;  %v70_v19 = vadd.f32 %v68_v17, %v65_v16 }
  0x93   :  { %v72_v18 = vsel %vm71_vm1, %v69_v15, 0.0  ;;  %v75_v20 = vsel %vm71_vm1, %v70_v19, 0.0 }
  0x94   :  { %73 = vadd.xlane.f32.xlu0 %v72_v18 }
  0x9c   :  { %76 = vadd.xlane.f32.xlu0 %v75_v20 }
 0x107   :  { %v74_v28 = vpop.xlane.xlu0 %73 }
 0x108   :  { %v85_v29 = vmul.f32 %v84_v27, %v74_v28 }
 0x10a   :  { %v87_v30 = vsub.f32 %v69_v15, %v85_v29 }
 0x10c   :  { %v89_v31 = vmul.f32 %v87_v30, %v87_v30 }
 0x10e   :  { %v91_v32 = vsel %vm71_vm1, %v89_v31, 0.0 }
 0x10f   :  { %92 = vadd.xlane.f32.xlu1 %v91_v32  ;;  %v77_v33 = vpop.xlane.xlu0 %76 }
 0x110   :  { %v86_v34 = vmul.f32 %v84_v27, %v77_v33 }
 0x112   :  { %v88_v35 = vsub.f32 %v70_v19, %v86_v34 }
 0x114   :  { %v90_v36 = vmul.f32 %v88_v35, %v88_v35 }
 0x116   :  { %v94_v37 = vsel %vm71_vm1, %v90_v36, 0.0 }
 0x117   :  { %95 = vadd.xlane.f32.xlu1 %v94_v37 }
 0x182   :  { %v93_v38 = vpop.xlane.xlu1 %92 }
 0x183   :  { %v97_v39 = vmul.f32 %v93_v38, %v84_v27 }
 0x185   :  { %v99_v40 = vadd.f32 1e-05, %v97_v39 }
 0x187   :  { %157 = vrsqrt.f32 %v99_v40  ;;  %vm107_vm4 = vweird.f32 %v99_v40 }
 0x18a   :  { %v96_v41 = vpop.xlane.xlu1 %95 }
 0x18b   :  { %v98_v42 = vmul.f32 %v96_v41, %v84_v27 }
 0x18d   :  { %v158_v43 = vpop.eup %157  ;;  %v100_v44 = vadd.f32 1e-05, %v98_v42 }
 0x18e   :  { %v102_v45 = vmul.f32 %v158_v43, %v99_v40  ;;  %vm108_vm3 = vweird.f32 %v158_v43 }
 0x18f   :  { %159 = vrsqrt.f32 %v100_v44  ;;  %vm109_vm5 = vmor %vm107_vm4, %vm108_vm3  ;;  %vm117_vm7 = vweird.f32 %v100_v44 }
 0x190   :  { %v103_v46 = vmul.f32 %v158_v43, %v102_v45 }
 0x192   :  { %v104_v47 = vmul.f32 0.5, %v103_v46 }
 0x194   :  { %v105_v48 = vsub.f32 1.5, %v104_v47 }
 0x195   :  { %v160_v49 = vpop.eup %159 }
 0x196   :  { %v106_v50 = vmul.f32 %v158_v43, %v105_v48  ;;  %v112_v51 = vmul.f32 %v160_v49, %v100_v44  ;;  %vm118_vm6 = vweird.f32 %v160_v49 }
 0x197   :  { %vm119_vm8 = vmor %vm117_vm7, %vm118_vm6 }
 0x198   :  { %v110_v53 = vsel %vm109_vm5, %v158_v43, %v106_v50  ;;  %v113_v54 = vmul.f32 %v160_v49, %v112_v51 }
 0x199   :  { %v121_v56 = vmul.f32 %v110_v53, %v87_v30 }
 0x19a   :  { %v114_v57 = vmul.f32 0.5, %v113_v54 }
 0x19b   :  { %v127_v58 = vmul.f32 %v153_v52, %v121_v56 }
 0x19c   :  { %v115_v59 = vsub.f32 1.5, %v114_v57 }
 0x19d   :  { %v133_v60 = vadd.f32 %v154_v55, %v127_v58 }
 0x19e   :  { %v116_v61 = vmul.f32 %v160_v49, %v115_v59 }
 0x19f   :  { %135 = vst.msk [vmem:[%s260_s6] sm:$0xff] %vm71_vm1, %v133_v60 }
 0x1a0   :  { %v120_v62 = vsel %vm119_vm8, %v160_v49, %v116_v61 }
 0x1a1   :  { %v122_v63 = vmul.f32 %v120_v62, %v88_v35 }
 0x1a3   :  { %v128_v0 = vmul.f32 %v153_v52, %v122_v63 }
 0x1a5   :  { %v134_v1 = vadd.f32 %v154_v55, %v128_v0 }
 0x1a7   :  { %136 = vst.msk [vmem:[%s260_s6 + $0x8] sm:$0xff] %vm71_vm1, %v134_v1 }

// kernel: decoder_layer.9
= control target key start
LH: loop header
LB: loop body
LE: loop exit
PB: predicated region body
PF: predicated region fallthrough
CT: control target
= control target key end

     0   :  { %s480_s12 = smov 0   ;;  %s523_s0 = inlined_call_operand.vmem [shape: f32[16,64], index: 0, kind: input, shape index: {}]   ;;  %s524_s1 = inlined_call_operand.vmem [shape: f32[16,64], index: 1, kind: input, shape index: {}]   ;;  %s525_s2 = inlined_call_operand.vmem [shape: f32[16,64], index: 2, kind: input, shape index: {}]   ;;  %s526_s3 = inlined_call_operand.vmem [shape: f32[16,64], index: 3, kind: output, shape index: {}]  }
   0x1 LB: > { %s415_s13 = sadd.s32 4294967295, %s456_s12   ;;  %p419_p0 = scmp.ge.s32.totalorder %s456_s12, 1  ;;  %s456_s12 = sphi %s480_s12, %s13_s12  }
   0x2   : > { %p154_p1 = scmp.lt.s32.totalorder %s456_s12, 3 }
   0x4   : > { %p155_p2 = pnand %p419_p0, %p154_p1 }
   0x5   : > { %p184_p3 = scmp.lt.s32.totalorder (!%p155_p2), %s415_s13, 1  ;;  %s458_s18 = smov (!%p155_p2), 96  }
   0x6   : > { %158 = sbr.rel (%p155_p2) target bundleno = 773 (0x305), region = 32  ;;  %s459_s25 = smov (!%p155_p2), 32  }
   0xb   : > { %s528_s13 = smov (!%p184_p3, %s415_s13), 1  ;;  %vm203_vm0 = vcmask 261120   ;;  %vm230_vm1 = vcmask 64512   ;;  %vm336_vm2 = vcmask 523264  }
   0xc   : > { %s488_s14 = sshll.u32 %s528_s13, 3 }
   0xd   : > { %s191_s17 = scalar_lea.vmem %s524_s1, %s488_s14  ;;  %s187_s21 = scalar_lea.vmem %s523_s0, %s488_s14 }
   0xe   : > { %v201_v0 = vld [vmem:[%s191_s17] sm:$0xff]  ;;  %s195_s24 = scalar_lea.vmem %s525_s2, %s488_s14  ;;  %s199_s28 = scalar_lea.vmem %s526_s3, %s488_s14 }
   0xf   : > { %267 = vrot.lane.b32.xlu0 %v201_v0, %s458_s18  ;;  %v200_v1 = vld [vmem:[%s187_s21] sm:$0xff]  ;;  %424 = vmatpush.xpose.msk.msra.mxu0 %vm203_vm0, %v201_v0 }
  0x10   : > { %v202_v8 = vld [vmem:[%s195_s24] sm:$0xff] }
  0x11   : > { %260 = vmatpush.msra.mxu1 %v202_v8 }
  0x12   : > { %425 = vmatmul.msk.f32.vlgmr.msra.gmra.mxu0 %vm203_vm0, %v200_v1 }
  0x17   : > { %265 = vrot.lane.b32.xlu0 %v200_v1, %s458_s18 }
  0x81   : > { %v268_v2 = vpop.permute.xlu0 %267 }
  0x82   : > { %427 = vmatpush.xpose.msk.msra.mxu2 %vm203_vm0, %v268_v2 }
  0x89   : > { %v266_v3 = vpop.permute.xlu0 %265 }
  0x8a   : > { %428 = vmatmul.msk.f32.vlgmr.msra.gmra.mxu2 %vm203_vm0, %v266_v3 }
  0x8f   : > { %v227_v6 = vpop.f32.mrf.mxu0 }
  0x90   : > { %v231_v7 = vsel %vm230_vm1, %v227_v6, -inf }
 0x10d   : > { %v290_v4 = vpop.f32.mrf.mxu2 }
 0x10e   : > { %v293_v5 = vsel %vm230_vm1, %v290_v4, -inf }
 0x10f   : > { %294 = vmax.xlane.f32.xlu1 %v293_v5 }
 0x117   : > { %232 = vmax.xlane.f32.xlu1 %v231_v7 }
 0x182   : > { %v295_v9 = vpop.xlane.xlu1 %294 }
 0x183   : > { %v296_v10 = vsub.f32 %v290_v4, %v295_v9 }
 0x185   : > { %v297_v11 = vmul.f32 1.442695, %v296_v10 }
 0x187   : > { %442 = vpow2.f32 %v297_v11 }
 0x18a   : > { %v233_v12 = vpop.xlane.xlu1 %232 }
 0x18b   : > { %v234_v13 = vsub.f32 %v227_v6, %v233_v12 }
 0x18d   : > { %v443_v14 = vpop.eup %442  ;;  %v235_v15 = vmul.f32 1.442695, %v234_v13 }
 0x18e   : > { %v299_v16 = vsel %vm230_vm1, %v443_v14, 0.0 }
 0x18f   : > { %444 = vpow2.f32 %v235_v15  ;;  %300 = vadd.xlane.f32.xlu2 %v299_v16 }
 0x195   : > { %v445_v17 = vpop.eup %444 }
 0x196   : > { %v237_v18 = vsel %vm230_vm1, %v445_v17, 0.0 }
 0x197   : > { %238 = vadd.xlane.f32.xlu0 %v237_v18 }
 0x1a7   : > { %305 = vrot.lane.b32.xlu2 %v202_v8, %s458_s18 }
 0x202   : > { %v301_v19 = vpop.xlane.xlu2 %300 }
 0x203   : > { %446 = vrcp.f32 %v301_v19 }
 0x209   : > { %v447_v20 = vpop.eup %446 }
 0x20a   : > { %v306_v21 = vpop.permute.xlu2 %305  ;;  %v239_v22 = vpop.xlane.xlu0 %238  ;;  %v303_v23 = vmul.f32 %v447_v20, %v443_v14 }
 0x20b   : > { %448 = vrcp.f32 %v239_v22  ;;  %326 = vmatpush.msra.mxu3 %v306_v21 }
 0x20c   : > { %429 = vmatmul.msk.f32.vlgmr.msra.gmra.mxu3 %vm230_vm1, %v303_v23 }
 0x211   : > { %v449_v24 = vpop.eup %448 }
 0x212   : > { %v241_v25 = vmul.f32 %v449_v24, %v445_v17 }
 0x214   : > { %426 = vmatmul.msk.f32.vlgmr.msra.gmra.mxu1 %vm230_vm1, %v241_v25 }
 0x28f   : > { %v328_v26 = vpop.f32.mrf.mxu3 }
 0x290   : > { %332 = vrot.lane.b32.xlu1 %v328_v26, %s459_s25 }
 0x291   : > { %v262_v27 = vpop.f32.mrf.mxu1 }
 0x302   : > { %v333_v28 = vpop.permute.xlu1 %332 }
 0x303   : > { %v335_v29 = vsel %vm203_vm0, %v262_v27, %v333_v28 }
 0x304   : > { %337 = vst.msk [vmem:[%s199_s28] sm:$0xff] %vm336_vm2, %v335_v29 }
 0x305 PF: > { %s13_s12 = sadd.s32 1, %s456_s12  }
 0x306   : > { %p10_p4 = scmp.ge.s32.totalorder %s13_s12, 4  }
 0x308   :  { %12 = sbr.rel (!%p10_p4) target bundleno = 1 (0x1), region = 68 }

// kernel: decoder_layer.11
= control target key start
LH: loop header
LB: loop body
LE: loop exit
PB: predicated region body
PF: predicated region fallthrough
CT: control target
= control target key end

     0   :  { %vm17_vm0 = vcmask 261120   ;;  %vm47_vm1 = vcmask 523264   ;;  %s99_s1 = inlined_call_operand.vmem [shape: f32[32,64], index: 1, kind: input, shape index: {}]   ;;  %s100_s0 = inlined_call_operand.vmem [shape: f32[16,32], index: 0, kind: input, shape index: {}]   ;;  %s101_s2 = inlined_call_operand.vmem [shape: f32[16,64], index: 2, kind: output, shape index: {}]  }
   0x1   :  { %v16_v0 = vld [vmem:[%s99_s1 + $0x18] sm:$0xff]  ;;  %v15_v1 = vld [vmem:[%s99_s1 + $0x10] sm:$0xff]  ;;  %v14_v2 = vld [vmem:[%s99_s1 + $0x8] sm:$0xff] }
   0x2   :  { %36 = vmatpush.msra.mxu0 %v16_v0  ;;  %56 = vmatpush.msra.mxu1 %v16_v0  ;;  %v13_v3 = vld [vmem:[%s99_s1] sm:$0xff]  ;;  %v12_v5 = vld [vmem:[%s100_s0 + $0x8] sm:$0xff] }
   0x3   :  { %v11_v4 = vld [vmem:[%s100_s0] sm:$0xff] }
   0x4   :  { %37 = vmatpush.msra.mxu0 %v15_v1  ;;  %57 = vmatpush.msra.mxu1 %v15_v1 }
   0x6   :  { %38 = vmatpush.msra.mxu0 %v14_v2  ;;  %58 = vmatpush.msra.mxu1 %v14_v2 }
   0x8   :  { %39 = vmatpush.msra.mxu0 %v13_v3  ;;  %59 = vmatpush.msra.mxu1 %v13_v3 }
   0x9   :  { %54 = vmatmul.msk.f32.vlgmr.msra.gmra.mxu0 %vm17_vm0, %v11_v4  ;;  %55 = vmatmul.msk.f32.vlgmr.msra.gmra.mxu1 %vm17_vm0, %v12_v5 }
  0x86   :  { %v41_v6 = vpop.f32.mrf.mxu0  ;;  %v44_v7 = vpop.f32.mrf.mxu1 }
  0x87   :  { %48 = vst.msk [vmem:[%s101_s2] sm:$0xff] %vm47_vm1, %v41_v6 }
  0x88   :  { %49 = vst.msk [vmem:[%s101_s2 + $0x8] sm:$0xff] %vm47_vm1, %v44_v7 }

// kernel: decoder_layer.12
= control target key start
LH: loop header
LB: loop body
LE: loop exit
PB: predicated region body
PF: predicated region fallthrough
CT: control target
= control target key end

     0   :  { %10 = vsyncpa [#allocation3], 0  ;;  %s309_s0 = inlined_call_operand.vmem [shape: f32[32,32], index: 0, kind: input, shape index: {}]   ;;  %s310_s1 = inlined_call_operand.hbm [shape: f32[32,64], index: 1, kind: input, shape index: {}]   ;;  %s311_s2 = inlined_call_operand.hbm [shape: f32[32,64], index: 2, kind: input, shape index: {}]   ;;  %s312_s3 = inlined_call_operand.vmem [shape: f32[32,64], index: 3, kind: output, shape index: {0}]   ;;  %s313_s4 = inlined_call_operand.vmem [shape: f32[32,64], index: 4, kind: output, shape index: {1}]  }
   0x1   :  { %s18_s17 = sshll.u32 %s310_s1, 4  ;;  %s19_s17 = int_to_ptr.hbm [resolvable:$true] %s18_s17 }
   0x2   :  { %11 = vsyncpa [#allocation5], 0  ;;  %s222_s18 = smov [#allocation2]   ;;  %s31_s22 = sshll.u32 %s311_s2, 4  ;;  %s32_s22 = int_to_ptr.hbm [resolvable:$true] %s31_s22 }
   0x3   :  { %s20_s19 = sshll.u32 %s222_s18, 4  ;;  %s223_s23 = smov 128   ;;  %s21_s19 = int_to_ptr.vmem [resolvable:$true] %s20_s19 }
   0x4   :  { %s224_s24 = smov 8   ;;  %s225_s25 = smov [#allocation4]  }
   0x5   :  { %26 = dma.hbm_to_vmem [thread:$0]  %s19_s17, 512, %s21_s19, [#allocation3], %s223_s23, %s223_s23, %s224_s24  }
   0x6   :  { %s33_s26 = sshll.u32 %s225_s25, 4  ;;  %s34_s26 = int_to_ptr.vmem [resolvable:$true] %s33_s26 }
   0x7   :  { %39 = dma.hbm_to_vmem [thread:$0]  %s32_s22, 512, %s34_s26, [#allocation5], %s223_s23, %s223_s23, %s224_s24  }
   0x8   :  { %218 = dma.done.wait [#allocation3], 512  }
   0x9   :  { %219 = vsyncadd [#allocation3], 4294966784 }
   0xa   :  { %220 = dma.done.wait [#allocation5], 512  }
   0xb   :  { %221 = vsyncadd [#allocation5], 4294966784  ;;  %v55_v0 = vld [vmem:[#allocation2 + $0x18] sm:$0xff]  ;;  %v54_v2 = vld [vmem:[#allocation2 + $0x10] sm:$0xff]  ;;  %vm56_vm0 = vcmask 261120   ;;  %vm98_vm1 = vcmask 523264  }
   0xc   :  { %v106_v1 = vld [vmem:[#allocation4 + $0x18] sm:$0xff]  ;;  %158 = vmatpush.msra.mxu2 %v55_v0  ;;  %v105_v3 = vld [vmem:[#allocation4 + $0x10] sm:$0xff]  ;;  %v53_v4 = vld [vmem:[#allocation2 + $0x8] sm:$0xff]  ;;  %81 = vmatpush.msra.mxu0 %v55_v0 }
   0xd   :  { %162 = vmatpush.msra.mxu3 %v106_v1  ;;  %v104_v5 = vld [vmem:[#allocation4 + $0x8] sm:$0xff]  ;;  %119 = vmatpush.msra.mxu1 %v106_v1  ;;  %v52_v6 = vld [vmem:[#allocation2] sm:$0xff]  ;;  %v50_v8 = vld [vmem:[%s309_s0 + $0x10] sm:$0xff] }
   0xe   :  { %159 = vmatpush.msra.mxu2 %v54_v2  ;;  %v103_v7 = vld [vmem:[#allocation4] sm:$0xff]  ;;  %82 = vmatpush.msra.mxu0 %v54_v2  ;;  %v51_v10 = vld [vmem:[%s309_s0 + $0x18] sm:$0xff]  ;;  %v49_v11 = vld [vmem:[%s309_s0 + $0x8] sm:$0xff] }
   0xf   :  { %163 = vmatpush.msra.mxu3 %v105_v3  ;;  %120 = vmatpush.msra.mxu1 %v105_v3  ;;  %v48_v9 = vld [vmem:[%s309_s0] sm:$0xff] }
  0x10   :  { %160 = vmatpush.msra.mxu2 %v53_v4  ;;  %83 = vmatpush.msra.mxu0 %v53_v4 }
  0x11   :  { %164 = vmatpush.msra.mxu3 %v104_v5  ;;  %121 = vmatpush.msra.mxu1 %v104_v5 }
  0x12   :  { %161 = vmatpush.msra.mxu2 %v52_v6  ;;  %84 = vmatpush.msra.mxu0 %v52_v6 }
  0x13   :  { %165 = vmatpush.msra.mxu3 %v103_v7  ;;  %152 = vmatmul.msk.f32.vlgmr.msra.gmra.mxu2 %vm56_vm0, %v50_v8 }
  0x14   :  { %156 = vmatmul.msk.f32.vlgmr.msra.gmra.mxu3 %vm56_vm0, %v50_v8  ;;  %122 = vmatpush.msra.mxu1 %v103_v7 }
  0x15   :  { %150 = vmatmul.msk.f32.vlgmr.msra.gmra.mxu0 %vm56_vm0, %v48_v9  ;;  %154 = vmatmul.msk.f32.vlgmr.msra.gmra.mxu1 %vm56_vm0, %v48_v9 }
  0x1b   :  { %153 = vmatmul.msk.f32.gmra.mxu2 %vm56_vm0, %v51_v10 }
  0x1c   :  { %157 = vmatmul.msk.f32.gmra.mxu3 %vm56_vm0, %v51_v10 }
  0x1d   :  { %151 = vmatmul.msk.f32.gmra.mxu0 %vm56_vm0, %v49_v11  ;;  %155 = vmatmul.msk.f32.gmra.mxu1 %vm56_vm0, %v49_v11 }
  0x92   :  { %v86_v12 = vpop.f32.mrf.mxu0  ;;  %v124_v13 = vpop.f32.mrf.mxu1 }
  0x93   :  { %99 = vst.msk [vmem:[%s312_s3] sm:$0xff] %vm98_vm1, %v86_v12 }
  0x94   :  { %136 = vst.msk [vmem:[%s313_s4] sm:$0xff] %vm98_vm1, %v124_v13 }
  0x96   :  { %v92_v14 = vpop.f32.mrf.mxu2 }
  0x97   :  { %v130_v15 = vpop.f32.mrf.mxu3  ;;  %101 = vst.msk [vmem:[%s312_s3 + $0x10] sm:$0xff] %vm98_vm1, %v92_v14 }
  0x98   :  { %138 = vst.msk [vmem:[%s313_s4 + $0x10] sm:$0xff] %vm98_vm1, %v130_v15 }
  0x9a   :  { %v89_v16 = vpop.f32.mrf.mxu0  ;;  %v127_v17 = vpop.f32.mrf.mxu1 }
  0x9b   :  { %100 = vst.msk [vmem:[%s312_s3 + $0x8] sm:$0xff] %vm98_vm1, %v89_v16 }
  0x9c   :  { %137 = vst.msk [vmem:[%s313_s4 + $0x8] sm:$0xff] %vm98_vm1, %v127_v17 }
  0x9e   :  { %v95_v18 = vpop.f32.mrf.mxu2 }
  0x9f   :  { %v133_v19 = vpop.f32.mrf.mxu3  ;;  %102 = vst.msk [vmem:[%s312_s3 + $0x18] sm:$0xff] %vm98_vm1, %v95_v18 }
  0xa0   :  { %139 = vst.msk [vmem:[%s313_s4 + $0x18] sm:$0xff] %vm98_vm1, %v133_v19 }
  0xa1   :  { %148 = vsyncpa [#allocation3], 1 }
  0xa2   :  { %149 = vsyncpa [#allocation5], 1 }

// kernel: decoder_layer.13
= control target key start
LH: loop header
LB: loop body
LE: loop exit
PB: predicated region body
PF: predicated region fallthrough
CT: control target
= control target key end

     0   :  { %s512_s12 = smov 0   ;;  %s555_s0 = inlined_call_operand.vmem [shape: f32[16,64], index: 0, kind: input, shape index: {}]   ;;  %s556_s1 = inlined_call_operand.vmem [shape: f32[32,64], index: 1, kind: input, shape index: {}]   ;;  %s557_s2 = inlined_call_operand.vmem [shape: f32[32,64], index: 2, kind: input, shape index: {}]   ;;  %s558_s3 = inlined_call_operand.vmem [shape: f32[16,64], index: 3, kind: output, shape index: {}]  }
   0x1 LB: > { %s438_s13 = sadd.s32 4294967295, %s488_s12   ;;  %p442_p0 = scmp.ge.s32.totalorder %s488_s12, 1  ;;  %s488_s12 = sphi %s512_s12, %s13_s12  }
   0x2   : > { %p158_p1 = scmp.lt.s32.totalorder %s488_s12, 3 }
   0x4   : > { %p159_p2 = pnand %p442_p0, %p158_p1 }
   0x5   : > { %s444_s14 = sshll.u32 (!%p159_p2), %s438_s13, 1  ;;  %p190_p4 = scmp.lt.s32.totalorder (!%p159_p2), %s438_s13, 1 }
   0x6   : > { %162 = sbr.rel (%p159_p2) target bundleno = 776 (0x308), region = 32  ;;  %p195_p3 = scmp.lt.s32.totalorder (!%p159_p2), %s444_s14, 3 }
   0x7   : > { %s490_s23 = smov (!%p159_p2), 96   ;;  %s491_s27 = smov (!%p159_p2), 32  }
   0xb   : > { %s560_s14 = smov (!%p195_p3, %s444_s14), 3  ;;  %s562_s13 = smov (!%p190_p4, %s438_s13), 1  ;;  %vm215_vm0 = vcmask 261120   ;;  %vm245_vm1 = vcmask 130048   ;;  %vm359_vm2 = vcmask 523264  }
   0xc   : > { %s445_s15 = sshll.u32 %s560_s14, 3  ;;  %s443_s22 = sshll.u32 %s562_s13, 3 }
   0xd   : > { %s198_s18 = scalar_lea.vmem %s556_s1, %s445_s15  ;;  %s204_s21 = scalar_lea.vmem %s557_s2, %s445_s15 }
   0xe   : > { %v212_v0 = vld [vmem:[%s198_s18 + $0x8] sm:$0xff]  ;;  %s193_s26 = scalar_lea.vmem %s555_s0, %s443_s22  ;;  %v213_v2 = vld [vmem:[%s204_s21] sm:$0xff]  ;;  %s209_s30 = scalar_lea.vmem %s558_s3, %s443_s22 }
   0xf   : > { %v214_v1 = vld [vmem:[%s204_s21 + $0x8] sm:$0xff]  ;;  %284 = vrot.lane.b32.xlu0 %v212_v0, %s490_s23  ;;  %v210_v3 = vld [vmem:[%s193_s26] sm:$0xff]  ;;  %449 = vmatpush.xpose.msk.msra.mxu0 %vm215_vm0, %v212_v0 }
  0x10   : > { %274 = vmatpush.msra.mxu1 %v214_v1  ;;  %280 = vrot.lane.b32.xlu1 %v210_v3, %s490_s23  ;;  %v211_v4 = vld [vmem:[%s198_s18] sm:$0xff]  ;;  %v469_v12 = vpack.i.bf16 %v213_v2, %v214_v1 }
  0x12   : > { %275 = vmatpush.msra.mxu1 %v213_v2 }
  0x13   : > { %450 = vmatpush.xpose.msk.msra.mxu0 %vm215_vm0, %v211_v4 }
  0x16   : > { %451 = vmatmul.msk.f32.vlgmr.msra.gmra.mxu0 %vm215_vm0, %v210_v3 }
  0x17   : > { %282 = vrot.lane.b32.xlu0 %v211_v4, %s490_s23 }
  0x1f   : > { %470 = vrot.lane.b32.xlu0 %v469_v12, %s490_s23 }
  0x81   : > { %v285_v5 = vpop.permute.xlu0 %284 }
  0x82   : > { %453 = vmatpush.xpose.msk.msra.mxu2 %vm215_vm0, %v285_v5  ;;  %v281_v7 = vpop.permute.xlu1 %280 }
  0x89   : > { %v283_v6 = vpop.permute.xlu0 %282 }
  0x8a   : > { %454 = vmatpush.xpose.msk.msra.mxu2 %vm215_vm0, %v283_v6 }
  0x8d   : > { %455 = vmatmul.msk.f32.vlgmr.msra.gmra.mxu2 %vm215_vm0, %v281_v7 }
  0x91   : > { %v471_v23 = vpop.permute.xlu0 %470 }
  0x92   : > { %v472_v24 = vunpack.i.l.bf16 %v471_v23  ;;  %v473_v25 = vunpack.i.h.bf16 %v471_v23 }
  0x93   : > { %v242_v8 = vpop.f32.mrf.mxu0 }
  0x94   : > { %v246_v9 = vsel %vm245_vm1, %v242_v8, -inf  ;;  %348 = vmatpush.msra.mxu3 %v472_v24 }
  0x95   : > { %247 = vmax.xlane.f32.xlu2 %v246_v9 }
  0x96   : > { %349 = vmatpush.msra.mxu3 %v473_v25 }
 0x108   : > { %v248_v14 = vpop.xlane.xlu2 %247 }
 0x109   : > { %v249_v17 = vsub.f32 %v242_v8, %v248_v14 }
 0x10b   : > { %v250_v18 = vmul.f32 1.442695, %v249_v17 }
 0x110   : > { %v309_v10 = vpop.f32.mrf.mxu2 }
 0x111   : > { %v312_v11 = vsel %vm245_vm1, %v309_v10, -inf }
 0x112   : > { %313 = vmax.xlane.f32.xlu1 %v312_v11 }
 0x185   : > { %v314_v13 = vpop.xlane.xlu1 %313 }
 0x186   : > { %v315_v15 = vsub.f32 %v309_v10, %v314_v13 }
 0x188   : > { %v316_v16 = vmul.f32 1.442695, %v315_v15 }
 0x18a   : > { %474 = vpow2.f32 %v316_v16 }
 0x18b   : > { %476 = vpow2.f32 %v250_v18 }
 0x190   : > { %v475_v19 = vpop.eup %474 }
 0x191   : > { %v318_v20 = vsel %vm245_vm1, %v475_v19, 0.0  ;;  %v477_v21 = vpop.eup %476 }
 0x192   : > { %319 = vadd.xlane.f32.xlu2 %v318_v20  ;;  %v252_v22 = vsel %vm245_vm1, %v477_v21, 0.0 }
 0x19a   : > { %253 = vadd.xlane.f32.xlu2 %v252_v22 }
 0x205   : > { %v320_v26 = vpop.xlane.xlu2 %319 }
 0x206   : > { %478 = vrcp.f32 %v320_v26 }
 0x20c   : > { %v479_v27 = vpop.eup %478 }
 0x20d   : > { %v254_v28 = vpop.xlane.xlu2 %253  ;;  %v322_v29 = vmul.f32 %v479_v27, %v475_v19 }
 0x20e   : > { %480 = vrcp.f32 %v254_v28 }
 0x20f   : > { %456 = vmatmul.msk.f32.vlgmr.msra.gmra.mxu3 %vm245_vm1, %v322_v29 }
 0x214   : > { %v481_v30 = vpop.eup %480 }
 0x215   : > { %v256_v31 = vmul.f32 %v481_v30, %v477_v21 }
 0x217   : > { %452 = vmatmul.msk.f32.vlgmr.msra.gmra.mxu1 %vm245_vm1, %v256_v31 }
 0x292   : > { %v351_v32 = vpop.f32.mrf.mxu3 }
 0x293   : > { %355 = vrot.lane.b32.xlu0 %v351_v32, %s491_s27 }
 0x294   : > { %v277_v33 = vpop.f32.mrf.mxu1 }
 0x305   : > { %v356_v34 = vpop.permute.xlu0 %355 }
 0x306   : > { %v358_v35 = vsel %vm215_vm0, %v277_v33, %v356_v34 }
 0x307   : > { %360 = vst.msk [vmem:[%s209_s30] sm:$0xff] %vm359_vm2, %v358_v35 }
 0x308 PF: > { %s13_s12 = sadd.s32 1, %s488_s12  }
 0x309   : > { %p10_p5 = scmp.ge.s32.totalorder %s13_s12, 4  }
 0x30b   :  { %12 = sbr.rel (!%p10_p5) target bundleno = 1 (0x1), region = 68 }

// kernel: decoder_layer.15
= control target key start
LH: loop header
LB: loop body
LE: loop exit
PB: predicated region body
PF: predicated region fallthrough
CT: control target
= control target key end

     0   :  { %vm37_vm0 = vcmask 261120   ;;  %s361_s0 = inlined_call_operand.vmem [shape: f32[16,32], index: 0, kind: input, shape index: {}]   ;;  %s362_s1 = inlined_call_operand.vmem [shape: f32[32,64], index: 1, kind: input, shape index: {}]   ;;  %s363_s2 = inlined_call_operand.vmem [shape: f32[1,64], index: 2, kind: input, shape index: {}]   ;;  %s364_s3 = inlined_call_operand.vmem [shape: f32[64,32], index: 3, kind: input, shape index: {}]   ;;  %s365_s4 = inlined_call_operand.vmem [shape: f32[1,32], index: 4, kind: input, shape index: {}]   ;;  %s366_s5 = inlined_call_operand.vmem [shape: f32[1,32], index: 5, kind: input, shape index: {}]   ;;  %s367_s6 = inlined_call_operand.vmem [shape: f32[1,32], index: 6, kind: input, shape index: {}]   ;;  %s368_s7 = inlined_call_operand.hbm [shape: f32[16,32], index: 7, kind: output, shape index: {}]  }
   0x1   :  { %v32_v0 = vld [vmem:[%s362_s1 + $0x18] sm:$0xff]  ;;  %v31_v1 = vld [vmem:[%s362_s1 + $0x10] sm:$0xff]  ;;  %v30_v2 = vld [vmem:[%s362_s1 + $0x8] sm:$0xff] }
   0x2   :  { %56 = vmatpush.msra.mxu0 %v32_v0  ;;  %200 = vmatpush.msra.mxu3 %v32_v0  ;;  %v76_v3 = vld [vmem:[%s364_s3 + $0x38] sm:$0xff]  ;;  %v29_v4 = vld [vmem:[%s362_s1] sm:$0xff]  ;;  %v75_v5 = vld [vmem:[%s364_s3 + $0x30] sm:$0xff] }
   0x3   :  { %v27_v6 = vld [vmem:[%s361_s0] sm:$0xff]  ;;  %96 = vmatpush.msra.mxu1 %v76_v3  ;;  %204 = vmatpush.msra.mxu2 %v76_v3  ;;  %v28_v7 = vld [vmem:[%s361_s0 + $0x8] sm:$0xff] }
   0x4   :  { %57 = vmatpush.msra.mxu0 %v31_v1  ;;  %201 = vmatpush.msra.mxu3 %v31_v1 }
   0x6   :  { %58 = vmatpush.msra.mxu0 %v30_v2  ;;  %202 = vmatpush.msra.mxu3 %v30_v2 }
   0x7   :  { %12 = vsyncpa [#allocation3], 0  ;;  %97 = vmatpush.msra.mxu1 %v75_v5  ;;  %v74_v8 = vld [vmem:[%s364_s3 + $0x28] sm:$0xff]  ;;  %205 = vmatpush.msra.mxu2 %v75_v5  ;;  %v73_v9 = vld [vmem:[%s364_s3 + $0x20] sm:$0xff]  ;;  %vm81_vm1 = vcmask 523264   ;;  %v252_v30 = vmov 32.0  }
   0x8   :  { %59 = vmatpush.msra.mxu0 %v29_v4  ;;  %203 = vmatpush.msra.mxu3 %v29_v4  ;;  %v72_v10 = vld [vmem:[%s364_s3 + $0x18] sm:$0xff]  ;;  %v71_v11 = vld [vmem:[%s364_s3 + $0x10] sm:$0xff]  ;;  %v70_v12 = vld [vmem:[%s364_s3 + $0x8] sm:$0xff]  ;;  %220 = vrcp.f32 %v252_v30  ;;  %s254_s12 = smov 128   ;;  %s255_s13 = smov 8  }
   0x9   :  { %196 = vmatmul.msk.f32.vlgmr.msra.gmra.mxu0 %vm37_vm0, %v27_v6  ;;  %197 = vmatmul.msk.f32.vlgmr.msra.gmra.mxu3 %vm37_vm0, %v28_v7  ;;  %v69_v13 = vld [vmem:[%s364_s3] sm:$0xff] }
   0xa   :  { %98 = vmatpush.msra.mxu1 %v74_v8  ;;  %206 = vmatpush.msra.mxu2 %v74_v8  ;;  %v216_v14 = vld [vmem:[%s363_s2] ss:$0 sm:$0xff] }
   0xb   :  { %v217_v21 = vld [vmem:[%s365_s4] ss:$0 sm:$0xff] }
   0xc   :  { %99 = vmatpush.msra.mxu1 %v73_v9  ;;  %207 = vmatpush.msra.mxu2 %v73_v9  ;;  %v218_v59 = vld [vmem:[%s366_s5] ss:$0 sm:$0xff]  ;;  %s253_s5 = smov [#allocation2]  }
   0xd   :  { %v219_v63 = vld [vmem:[%s367_s6] ss:$0 sm:$0xff]  ;;  %s182_s9 = sshll.u32 %s253_s5, 4  ;;  %s184_s6 = sshll.u32 %s368_s7, 4  ;;  %s183_s9 = int_to_ptr.vmem [resolvable:$true] %s182_s9  ;;  %s185_s6 = int_to_ptr.hbm [resolvable:$true] %s184_s6 }
   0xe   :  { %100 = vmatpush.msra.mxu1 %v72_v10  ;;  %208 = vmatpush.msra.mxu2 %v72_v10  ;;  %v221_v31 = vpop.eup %220 }
   0xf   :  { %v120_v32 = vmul.f32 32.0, %v221_v31  ;;  %vm124_vm2 = vweird.f32 %v221_v31 }
  0x10   :  { %101 = vmatpush.msra.mxu1 %v71_v11  ;;  %209 = vmatpush.msra.mxu2 %v71_v11 }
  0x11   :  { %v121_v33 = vsub.f32 1.0, %v120_v32 }
  0x12   :  { %102 = vmatpush.msra.mxu1 %v70_v12  ;;  %210 = vmatpush.msra.mxu2 %v70_v12 }
  0x13   :  { %v122_v34 = vmul.f32 %v221_v31, %v121_v33 }
  0x14   :  { %103 = vmatpush.msra.mxu1 %v69_v13  ;;  %211 = vmatpush.msra.mxu2 %v69_v13 }
  0x15   :  { %v123_v35 = vadd.f32 %v221_v31, %v122_v34 }
  0x17   :  { %v125_v36 = vsel %vm124_vm2, %v221_v31, %v123_v35 }
  0x86   :  { %v61_v15 = vpop.f32.mrf.mxu0 }
  0x87   :  { %v62_v16 = vadd.f32 %v216_v14, %v61_v15 }
  0x89   :  { %v67_v17 = vmax.f32 %v62_v16, 0.0 }
  0x8b   :  { %198 = vmatmul.msk.f32.vlgmr.msra.gmra.mxu1 %vm81_vm1, %v67_v17 }
  0x8c   :  { %v64_v18 = vpop.f32.mrf.mxu3 }
  0x8d   :  { %v65_v19 = vadd.f32 %v216_v14, %v64_v18 }
  0x8f   :  { %v68_v20 = vmax.f32 %v65_v19, 0.0 }
  0x91   :  { %199 = vmatmul.msk.f32.vlgmr.msra.gmra.mxu2 %vm81_vm1, %v68_v20 }
 0x108   :  { %v105_v22 = vpop.f32.mrf.mxu1 }
 0x109   :  { %v106_v23 = vadd.f32 %v217_v21, %v105_v22 }
 0x10b   :  { %v111_v24 = vadd.f32 %v106_v23, %v27_v6 }
 0x10d   :  { %v113_v25 = vsel %vm37_vm0, %v111_v24, 0.0 }
 0x10e   :  { %114 = vadd.xlane.f32.xlu0 %v113_v25 }
 0x114   :  { %v108_v26 = vpop.f32.mrf.mxu2 }
 0x115   :  { %v109_v27 = vadd.f32 %v217_v21, %v108_v26 }
 0x117   :  { %v112_v28 = vadd.f32 %v109_v27, %v28_v7 }
 0x119   :  { %v116_v29 = vsel %vm37_vm0, %v112_v28, 0.0 }
 0x11a   :  { %117 = vadd.xlane.f32.xlu0 %v116_v29 }
 0x181   :  { %v115_v37 = vpop.xlane.xlu0 %114 }
 0x182   :  { %v126_v38 = vmul.f32 %v125_v36, %v115_v37 }
 0x184   :  { %v128_v39 = vsub.f32 %v111_v24, %v126_v38 }
 0x186   :  { %v130_v40 = vmul.f32 %v128_v39, %v128_v39 }
 0x188   :  { %v132_v41 = vsel %vm37_vm0, %v130_v40, 0.0 }
 0x189   :  { %133 = vadd.xlane.f32.xlu1 %v132_v41 }
 0x18d   :  { %v118_v42 = vpop.xlane.xlu0 %117 }
 0x18e   :  { %v127_v43 = vmul.f32 %v125_v36, %v118_v42 }
 0x190   :  { %v129_v44 = vsub.f32 %v112_v28, %v127_v43 }
 0x192   :  { %v131_v45 = vmul.f32 %v129_v44, %v129_v44 }
 0x194   :  { %v135_v46 = vsel %vm37_vm0, %v131_v45, 0.0 }
 0x195   :  { %136 = vadd.xlane.f32.xlu1 %v135_v46 }
 0x1fc   :  { %v134_v47 = vpop.xlane.xlu1 %133 }
 0x1fd   :  { %v138_v48 = vmul.f32 %v134_v47, %v125_v36 }
 0x1ff   :  { %v140_v49 = vadd.f32 1e-05, %v138_v48 }
 0x201   :  { %222 = vrsqrt.f32 %v140_v49  ;;  %vm148_vm4 = vweird.f32 %v140_v49 }
 0x207   :  { %v223_v50 = vpop.eup %222 }
 0x208   :  { %v143_v51 = vmul.f32 %v223_v50, %v140_v49  ;;  %v137_v52 = vpop.xlane.xlu1 %136  ;;  %vm149_vm3 = vweird.f32 %v223_v50 }
 0x209   :  { %v139_v53 = vmul.f32 %v137_v52, %v125_v36  ;;  %vm150_vm5 = vmor %vm148_vm4, %vm149_vm3 }
 0x20a   :  { %v144_v54 = vmul.f32 %v223_v50, %v143_v51 }
 0x20b   :  { %v141_v55 = vadd.f32 1e-05, %v139_v53 }
 0x20c   :  { %v145_v56 = vmul.f32 0.5, %v144_v54 }
 0x20d   :  { %224 = vrsqrt.f32 %v141_v55  ;;  %vm158_vm7 = vweird.f32 %v141_v55 }
 0x20e   :  { %v146_v57 = vsub.f32 1.5, %v145_v56 }
 0x210   :  { %v147_v58 = vmul.f32 %v223_v50, %v146_v57 }
 0x212   :  { %v151_v60 = vsel %vm150_vm5, %v223_v50, %v147_v58 }
 0x213   :  { %v225_v61 = vpop.eup %224  ;;  %v162_v62 = vmul.f32 %v151_v60, %v128_v39 }
 0x214   :  { %v153_v0 = vmul.f32 %v225_v61, %v141_v55  ;;  %vm159_vm6 = vweird.f32 %v225_v61 }
 0x215   :  { %v168_v1 = vmul.f32 %v218_v59, %v162_v62  ;;  %vm160_vm8 = vmor %vm158_vm7, %vm159_vm6 }
 0x216   :  { %v154_v2 = vmul.f32 %v225_v61, %v153_v0 }
 0x217   :  { %v174_v3 = vadd.f32 %v219_v63, %v168_v1 }
 0x218   :  { %v155_v4 = vmul.f32 0.5, %v154_v2 }
 0x219   :  { %176 = vst.msk [vmem:[#allocation2] sm:$0xff] %vm37_vm0, %v174_v3 }
 0x21a   :  { %v156_v5 = vsub.f32 1.5, %v155_v4 }
 0x21c   :  { %v157_v6 = vmul.f32 %v225_v61, %v156_v5 }
 0x21e   :  { %v161_v7 = vsel %vm160_vm8, %v225_v61, %v157_v6 }
 0x21f   :  { %v163_v8 = vmul.f32 %v161_v7, %v129_v44 }
 0x221   :  { %v169_v9 = vmul.f32 %v218_v59, %v163_v8 }
 0x223   :  { %v175_v10 = vadd.f32 %v219_v63, %v169_v9 }
 0x225   :  { %177 = vst.msk [vmem:[#allocation2 + $0x8] sm:$0xff] %vm37_vm0, %v175_v10 }
 0x226   :  { %190 = dma.vmem_to_hbm [thread:$0]  %s183_s9, 256, %s185_s6, [#allocation3], %s254_s12, %s254_s12, %s255_s13  }
 0x227   :  { %250 = dma.done.wait [#allocation3], 256  }
 0x228   :  { %251 = vsyncadd [#allocation3], 4294967040 }
 0x229   :  { %195 = vsyncpa [#allocation3], 1 }

</bundles_post_ra>
